<compile_context>
chip_gen: v5e
topology: v5e:2x2
jax: 0.10.0
libtpu: 0.0.40
codegen_flags: <defaults>
</compile_context>

<pallas_src>
import itertools
from collections import namedtuple
from functools import partial

import numpy as np
import jax
import jax.numpy as jnp
from jax.experimental import pallas as pl
from jax.experimental.pallas import tpu as pltpu

State = namedtuple("State", ["obs", "description", "inventory"])


def _round_up(x, m):
    return ((x + m - 1) // m) * m


# ----------------------------------------------------------------------------
# Fused GRU kernel: grid=(4,) over the encoders (parallel).  Per grid step the
# whole (T*N) token block, the embedding table and this encoder's weights are
# VMEM resident.  Embedding lookup is a one-hot matmul, the input projection is
# one GEMM per gate over all timesteps, and only h @ W_hh runs per time step.
# Gate order follows PyTorch nn.GRU: [r, z, n].
# ----------------------------------------------------------------------------
def _fused_gru_kernel(tok_ref, len_ref, emb_ref, wih_ref, whh_ref,
                      bih_ref, bhh_ref, h_ref):
    N = len_ref.shape[1]
    TN = tok_ref.shape[1]
    T = TN // N
    V, E = emb_ref.shape
    H = h_ref.shape[-1]

    # --- fused embedding gather (one-hot matmul against VMEM-resident table) ---
    tok = tok_ref[0]                                              # (T*N, 1) int32
    ids = jax.lax.broadcasted_iota(jnp.int32, (TN, V), 1)
    one_hot = (ids == tok).astype(jnp.bfloat16)                   # (T*N, V)

    emb = emb_ref[...]                                            # (V, E) bf16

    # --- hoisted input projection: one GEMM per gate over ALL timesteps ---
    def in_proj(g):
        ew = jnp.dot(emb, wih_ref[0, g],
                     preferred_element_type=jnp.float32).astype(jnp.bfloat16)  # (V, H)
        gi = jnp.dot(one_hot, ew, preferred_element_type=jnp.float32)          # (T*N, H)
        return gi + bih_ref[0, g]

    gi_r = in_proj(0)
    gi_z = in_proj(1)
    gi_n = in_proj(2)

    whh_r, whh_z, whh_n = whh_ref[0, 0], whh_ref[0, 1], whh_ref[0, 2]   # (H, H) bf16
    bhh_r, bhh_z, bhh_n = bhh_ref[0, 0], bhh_ref[0, 1], bhh_ref[0, 2]   # (1, H) f32
    lengths = len_ref[0]                                                # (N, 1) int32

    # --- recurrence: only h @ W_hh per step; T is small & static -> unrolled ---
    h = jnp.zeros((N, H), jnp.float32)
    for t in range(T):
        hb = h.astype(jnp.bfloat16)
        hr = jnp.dot(hb, whh_r, preferred_element_type=jnp.float32) + bhh_r
        hz = jnp.dot(hb, whh_z, preferred_element_type=jnp.float32) + bhh_z
        hn = jnp.dot(hb, whh_n, preferred_element_type=jnp.float32) + bhh_n
        row = slice(t * N, (t + 1) * N)                      # sublane-aligned slice
        r = jax.nn.sigmoid(gi_r[row] + hr)
        z = jax.nn.sigmoid(gi_z[row] + hz)
        n = jnp.tanh(gi_n[row] + r * hn)
        h_new = (1.0 - z) * n + z * h
        h = jnp.where(lengths > t, h_new, h)                 # freeze past seq length

    h_ref[0] = h


def fused_gru(tokens_flat, lengths, emb, wih, whh, bih, bhh):
    """tokens_flat: (4, T*N, 1) int32; lengths: (4, N, 1) int32 -> (4, N, H) f32."""
    n_enc, TN, _ = tokens_flat.shape
    N = lengths.shape[1]
    V, E = emb.shape
    H = whh.shape[-1]
    return pl.pallas_call(
        _fused_gru_kernel,
        out_shape=jax.ShapeDtypeStruct((n_enc, N, H), jnp.float32),
        grid_spec=pltpu.PrefetchScalarGridSpec(
            num_scalar_prefetch=0,
            grid=(n_enc,),
            in_specs=[
                pl.BlockSpec((1, TN, 1), lambda e: (e, 0, 0)),      # token ids
                pl.BlockSpec((1, N, 1), lambda e: (e, 0, 0)),       # lengths
                pl.BlockSpec((V, E), lambda e: (0, 0)),             # embedding table
                pl.BlockSpec((1, 3, E, H), lambda e: (e, 0, 0, 0)),  # W_ih^T per gate
                pl.BlockSpec((1, 3, H, H), lambda e: (e, 0, 0, 0)),  # W_hh^T per gate
                pl.BlockSpec((1, 3, 1, H), lambda e: (e, 0, 0, 0)),  # b_ih per gate
                pl.BlockSpec((1, 3, 1, H), lambda e: (e, 0, 0, 0)),  # b_hh per gate
            ],
            out_specs=pl.BlockSpec((1, N, H), lambda e: (e, 0, 0)),
        ),
        compiler_params=pltpu.CompilerParams(
            dimension_semantics=("parallel",)),   # encoders are independent
    )(tokens_flat, lengths, emb, wih, whh, bih, bhh)


# ----------------------------------------------------------------------------
# MLP reward head: Linear(4H -> H) + ReLU, then Linear(H -> 1) expressed as an
# elementwise multiply + lane reduction (avoids a lane-1 RHS matmul).
# ----------------------------------------------------------------------------
def _mlp_kernel(x_ref, w1_ref, b1_ref, w2_ref, b2_ref, out_ref):
    x = x_ref[...].astype(jnp.bfloat16)
    h = jnp.dot(x, w1_ref[...], preferred_element_type=jnp.float32) + b1_ref[...]
    h = jnp.maximum(h, 0.0)
    out_ref[...] = jnp.sum(h * w2_ref[...], axis=-1, keepdims=True) + b2_ref[...]


def mlp_head(x, w1, b1, w2, b2):
    A, F = x.shape
    H = w1.shape[1]
    return pl.pallas_call(
        _mlp_kernel,
        out_shape=jax.ShapeDtypeStruct((A, 1), jnp.float32),
        grid=(1,),
        in_specs=[
            pl.BlockSpec((A, F), lambda i: (0, 0)),
            pl.BlockSpec((F, H), lambda i: (0, 0)),
            pl.BlockSpec((1, H), lambda i: (0, 0)),
            pl.BlockSpec((1, H), lambda i: (0, 0)),
            pl.BlockSpec((1, 1), lambda i: (0, 0)),
        ],
        out_specs=pl.BlockSpec((A, 1), lambda i: (0, 0)),
    )(x, w1, b1, w2, b2)


# ----------------------------------------------------------------------------
# Device-side forward (jitted): fused encoder kernel -> gather/concat glue ->
# MLP head kernel.  B (n_states) and A (n_acts) are static for the slicing.
# TODO(synk): the MLP epilogue is not fused into the encoder pallas_call because
# it needs the outputs of all 4 grid steps (cross-step dependency); it stays a
# second tiny kernel and the ragged state->action expansion is XLA glue.
# ----------------------------------------------------------------------------
@partial(jax.jit, static_argnums=(4, 5))
def _device_forward(params, tokens_flat, lengths, state_idx, n_states, n_acts):
    h_out = fused_gru(tokens_flat, lengths, params["emb"],
                      params["gru_wih"], params["gru_whh"],
                      params["gru_bih"], params["gru_bhh"])          # (4, N_pad, H)

    obs_out = h_out[0, :n_states]
    look_out = h_out[1, :n_states]
    inv_out = h_out[2, :n_states]
    act_out = h_out[3, :n_acts]                                      # (A, H)

    state_out = jnp.concatenate([obs_out, look_out, inv_out], axis=1)   # (B, 3H)
    state_rep = jnp.take(state_out, state_idx, axis=0)                  # (A, 3H)
    full = jnp.concatenate([state_rep, act_out], axis=1)                # (A, 4H)

    a_pad = _round_up(n_acts, 8)
    full = jnp.pad(full, ((0, a_pad - n_acts), (0, 0)))                 # sublane pad

    w1, b1, w2, b2 = params["net"]
    rewards = mlp_head(full, w1, b1, w2, b2)[:n_acts, 0]                # (A,)
    return rewards


# ----------------------------------------------------------------------------
# Host glue: padding/bucketing and parameter init.
# ----------------------------------------------------------------------------
def init_params(key, vocab_size, embedding_dim, hidden_dim):
    V, E, H = vocab_size, embedding_dim, hidden_dim
    keys = iter(jax.random.split(key, 16))

    def u(shape, scale, dtype=jnp.float32):
        x = jax.random.uniform(next(keys), shape, jnp.float32, -scale, scale)
        return x.astype(dtype)

    k_gru = 1.0 / np.sqrt(H)
    k_l1 = 1.0 / np.sqrt(4 * H)

    return {
        # bf16 weights, f32 biases (f32 accumulation inside the kernels)
        "emb": jax.random.normal(next(keys), (V, E), jnp.float32).astype(jnp.bfloat16),
        # 4 encoders (obs, look, inv, act) x 3 gates (r, z, n), pre-transposed
        "gru_wih": u((4, 3, E, H), k_gru, jnp.bfloat16),
        "gru_whh": u((4, 3, H, H), k_gru, jnp.bfloat16),
        "gru_bih": u((4, 3, 1, H), k_gru),
        "gru_bhh": u((4, 3, 1, H), k_gru),
        "net": (u((4 * H, H), k_l1, jnp.bfloat16), u((1, H), k_l1),
                u((1, H), k_gru), u((1, 1), k_gru)),
    }


def moral_network_forward(params, state_batch, act_batch):
    state = State(*zip(*state_batch))
    act_sizes = [len(a) for a in act_batch]
    flat_acts = list(itertools.chain.from_iterable(act_batch))

    groups = [list(state.obs), list(state.description), list(state.inventory), flat_acts]
    B, A = len(state_batch), len(flat_acts)

    # bucket time and row dims to multiples of 8 (sublanes / fewer recompiles)
    T = _round_up(max(len(s) for g in groups for s in g), 8)
    N = _round_up(max(B, A), 8)

    tokens = np.zeros((4, T, N), np.int32)
    lengths = np.zeros((4, N, 1), np.int32)
    for e, g in enumerate(groups):
        for i, s in enumerate(g):
            tokens[e, :len(s), i] = np.asarray(s, np.int32)
            lengths[e, i, 0] = len(s)
    tokens_flat = tokens.reshape(4, T * N, 1)          # row t*N + n

    state_idx = np.repeat(np.arange(B, dtype=np.int32), act_sizes)   # (A,)

    rewards = _device_forward(params, jnp.asarray(tokens_flat),
                              jnp.asarray(lengths), jnp.asarray(state_idx), B, A)

    out, off = [], 0
    for j in act_sizes:
        out.append(rewards[off:off + j])
        off += j
    return out


if __name__ == "__main__":
    vocab_size, embedding_dim, dim_action, hidden_dim = 50, 16, 4, 32

    key = jax.random.PRNGKey(0)
    key, pkey, tkey = jax.random.split(key, 3)
    params = init_params(pkey, vocab_size, embedding_dim, hidden_dim)

    # deterministic small token stream to build ragged sequences from
    toks = [int(t) for t in jax.random.randint(tkey, (40,), 1, vocab_size)]

    state_batch = [
        State(obs=toks[0:4], description=toks[4:6], inventory=toks[6:9]),
        State(obs=toks[9:12], description=toks[12:17], inventory=toks[17:18]),
    ]
    act_batch = [
        [toks[18:20], toks[20:23]],                 # 2 actions for state 0
        [toks[23:27], toks[27:28], toks[28:30]],    # 3 actions for state 1
    ]

    rewards = moral_network_forward(params, state_batch, act_batch)
    rewards = [jax.block_until_ready(r) for r in rewards]
    assert len(rewards) == 2 and rewards[0].shape == (2,) and rewards[1].shape == (3,)
    print("KERNEL_OK")
</pallas_src>

<mosaic_0001>
module attributes {stable_mosaic.version = 11 : i64} {
  func.func @_fused_gru_kernel(%arg0: i32, %arg1: memref<1x64x1xi32, #tpu.memory_space<vmem>>, %arg2: memref<1x8x1xi32, #tpu.memory_space<vmem>>, %arg3: memref<50x16xbf16, #tpu.memory_space<vmem>>, %arg4: memref<1x3x16x32xbf16, #tpu.memory_space<vmem>>, %arg5: memref<1x3x32x32xbf16, #tpu.memory_space<vmem>>, %arg6: memref<1x3x1x32xf32, #tpu.memory_space<vmem>>, %arg7: memref<1x3x1x32xf32, #tpu.memory_space<vmem>>, %arg8: memref<1x8x32xf32, #tpu.memory_space<vmem>>) attributes {dimension_semantics = [#tpu.dimension_semantics<parallel>], iteration_bounds = array<i64: 4>, scalar_prefetch = 0 : i64, scratch_operands = 0 : i64, tpu.core_type = #tpu.core_type<tc>, window_params = [{transform_indices = @transform_0, window_bounds = array<i64: 1, 64, 1>}, {transform_indices = @transform_1, window_bounds = array<i64: 1, 8, 1>}, {pipeline_mode = #tpu.pipeline_mode<synchronous>, transform_indices = @transform_2, window_bounds = array<i64: 50, 16>}, {transform_indices = @transform_3, window_bounds = array<i64: 1, 3, 16, 32>}, {transform_indices = @transform_4, window_bounds = array<i64: 1, 3, 32, 32>}, {transform_indices = @transform_5, window_bounds = array<i64: 1, 3, 1, 32>}, {transform_indices = @transform_6, window_bounds = array<i64: 1, 3, 1, 32>}, {transform_indices = @transform_7, window_bounds = array<i64: 1, 8, 32>}]} {
    %c0 = arith.constant 0 : index
    %c0_0 = arith.constant 0 : index
    %c0_1 = arith.constant 0 : index
    %0 = vector.load %arg1[%c0, %c0_0, %c0_1] : memref<1x64x1xi32, #tpu.memory_space<vmem>>, vector<1x64x1xi32>
    %1 = vector.shape_cast %0 : vector<1x64x1xi32> to vector<64x1xi32>
    %2 = tpu.iota {dimensions = array<i32: 1>} : vector<64x50xi32>
    %3 = vector.broadcast %1 : vector<64x1xi32> to vector<64x50xi32>
    %4 = arith.cmpi eq, %2, %3 : vector<64x50xi32>
    %5 = arith.extui %4 : vector<64x50xi1> to vector<64x50xi32>
    %6 = arith.sitofp %5 : vector<64x50xi32> to vector<64x50xf32>
    %7 = arith.truncf %6 : vector<64x50xf32> to vector<64x50xbf16>
    %c0_2 = arith.constant 0 : index
    %c0_3 = arith.constant 0 : index
    %8 = vector.load %arg3[%c0_2, %c0_3] : memref<50x16xbf16, #tpu.memory_space<vmem>>, vector<50x16xbf16>
    %c0_4 = arith.constant 0 : index
    %c0_5 = arith.constant 0 : index
    %c0_6 = arith.constant 0 : index
    %c0_7 = arith.constant 0 : index
    %9 = vector.load %arg4[%c0_4, %c0_5, %c0_6, %c0_7] : memref<1x3x16x32xbf16, #tpu.memory_space<vmem>>, vector<1x1x16x32xbf16>
    %10 = vector.shape_cast %9 : vector<1x1x16x32xbf16> to vector<16x32xbf16>
    %cst = arith.constant dense<0.000000e+00> : vector<50x32xf32>
    %11 = tpu.matmul %8, %10, %cst {dimension_numbers = #tpu.dot_dimension_numbers<[1], [0], [0], [1], [0, 0, 1, 1], [], []>} : vector<50x16xbf16>, vector<16x32xbf16>, vector<50x32xf32> -> vector<50x32xf32>
    %12 = arith.truncf %11 : vector<50x32xf32> to vector<50x32xbf16>
    %cst_8 = arith.constant dense<0.000000e+00> : vector<64x32xf32>
    %13 = tpu.matmul %7, %12, %cst_8 {dimension_numbers = #tpu.dot_dimension_numbers<[1], [0], [0], [1], [0, 0, 1, 1], [], []>} : vector<64x50xbf16>, vector<50x32xbf16>, vector<64x32xf32> -> vector<64x32xf32>
    %c0_9 = arith.constant 0 : index
    %c0_10 = arith.constant 0 : index
    %c0_11 = arith.constant 0 : index
    %c0_12 = arith.constant 0 : index
    %14 = vector.load %arg6[%c0_9, %c0_10, %c0_11, %c0_12] : memref<1x3x1x32xf32, #tpu.memory_space<vmem>>, vector<1x1x1x32xf32>
    %15 = vector.shape_cast %14 : vector<1x1x1x32xf32> to vector<1x32xf32>
    %16 = vector.broadcast %15 : vector<1x32xf32> to vector<64x32xf32>
    %17 = arith.addf %13, %16 : vector<64x32xf32>
    %c0_13 = arith.constant 0 : index
    %c1 = arith.constant 1 : index
    %c0_14 = arith.constant 0 : index
    %c0_15 = arith.constant 0 : index
    %18 = vector.load %arg4[%c0_13, %c1, %c0_14, %c0_15] : memref<1x3x16x32xbf16, #tpu.memory_space<vmem>>, vector<1x1x16x32xbf16>
    %19 = vector.shape_cast %18 : vector<1x1x16x32xbf16> to vector<16x32xbf16>
    %cst_16 = arith.constant dense<0.000000e+00> : vector<50x32xf32>
    %20 = tpu.matmul %8, %19, %cst_16 {dimension_numbers = #tpu.dot_dimension_numbers<[1], [0], [0], [1], [0, 0, 1, 1], [], []>} : vector<50x16xbf16>, vector<16x32xbf16>, vector<50x32xf32> -> vector<50x32xf32>
    %21 = arith.truncf %20 : vector<50x32xf32> to vector<50x32xbf16>
    %cst_17 = arith.constant dense<0.000000e+00> : vector<64x32xf32>
    %22 = tpu.matmul %7, %21, %cst_17 {dimension_numbers = #tpu.dot_dimension_numbers<[1], [0], [0], [1], [0, 0, 1, 1], [], []>} : vector<64x50xbf16>, vector<50x32xbf16>, vector<64x32xf32> -> vector<64x32xf32>
    %c0_18 = arith.constant 0 : index
    %c1_19 = arith.constant 1 : index
    %c0_20 = arith.constant 0 : index
    %c0_21 = arith.constant 0 : index
    %23 = vector.load %arg6[%c0_18, %c1_19, %c0_20, %c0_21] : memref<1x3x1x32xf32, #tpu.memory_space<vmem>>, vector<1x1x1x32xf32>
    %24 = vector.shape_cast %23 : vector<1x1x1x32xf32> to vector<1x32xf32>
    %25 = vector.broadcast %24 : vector<1x32xf32> to vector<64x32xf32>
    %26 = arith.addf %22, %25 : vector<64x32xf32>
    %c0_22 = arith.constant 0 : index
    %c2 = arith.constant 2 : index
    %c0_23 = arith.constant 0 : index
    %c0_24 = arith.constant 0 : index
    %27 = vector.load %arg4[%c0_22, %c2, %c0_23, %c0_24] : memref<1x3x16x32xbf16, #tpu.memory_space<vmem>>, vector<1x1x16x32xbf16>
    %28 = vector.shape_cast %27 : vector<1x1x16x32xbf16> to vector<16x32xbf16>
    %cst_25 = arith.constant dense<0.000000e+00> : vector<50x32xf32>
    %29 = tpu.matmul %8, %28, %cst_25 {dimension_numbers = #tpu.dot_dimension_numbers<[1], [0], [0], [1], [0, 0, 1, 1], [], []>} : vector<50x16xbf16>, vector<16x32xbf16>, vector<50x32xf32> -> vector<50x32xf32>
    %30 = arith.truncf %29 : vector<50x32xf32> to vector<50x32xbf16>
    %cst_26 = arith.constant dense<0.000000e+00> : vector<64x32xf32>
    %31 = tpu.matmul %7, %30, %cst_26 {dimension_numbers = #tpu.dot_dimension_numbers<[1], [0], [0], [1], [0, 0, 1, 1], [], []>} : vector<64x50xbf16>, vector<50x32xbf16>, vector<64x32xf32> -> vector<64x32xf32>
    %c0_27 = arith.constant 0 : index
    %c2_28 = arith.constant 2 : index
    %c0_29 = arith.constant 0 : index
    %c0_30 = arith.constant 0 : index
    %32 = vector.load %arg6[%c0_27, %c2_28, %c0_29, %c0_30] : memref<1x3x1x32xf32, #tpu.memory_space<vmem>>, vector<1x1x1x32xf32>
    %33 = vector.shape_cast %32 : vector<1x1x1x32xf32> to vector<1x32xf32>
    %34 = vector.broadcast %33 : vector<1x32xf32> to vector<64x32xf32>
    %35 = arith.addf %31, %34 : vector<64x32xf32>
    %c0_31 = arith.constant 0 : index
    %c0_32 = arith.constant 0 : index
    %c0_33 = arith.constant 0 : index
    %c0_34 = arith.constant 0 : index
    %36 = vector.load %arg5[%c0_31, %c0_32, %c0_33, %c0_34] : memref<1x3x32x32xbf16, #tpu.memory_space<vmem>>, vector<1x1x32x32xbf16>
    %37 = vector.shape_cast %36 : vector<1x1x32x32xbf16> to vector<32x32xbf16>
    %c0_35 = arith.constant 0 : index
    %c1_36 = arith.constant 1 : index
    %c0_37 = arith.constant 0 : index
    %c0_38 = arith.constant 0 : index
    %38 = vector.load %arg5[%c0_35, %c1_36, %c0_37, %c0_38] : memref<1x3x32x32xbf16, #tpu.memory_space<vmem>>, vector<1x1x32x32xbf16>
    %39 = vector.shape_cast %38 : vector<1x1x32x32xbf16> to vector<32x32xbf16>
    %c0_39 = arith.constant 0 : index
    %c2_40 = arith.constant 2 : index
    %c0_41 = arith.constant 0 : index
    %c0_42 = arith.constant 0 : index
    %40 = vector.load %arg5[%c0_39, %c2_40, %c0_41, %c0_42] : memref<1x3x32x32xbf16, #tpu.memory_space<vmem>>, vector<1x1x32x32xbf16>
    %41 = vector.shape_cast %40 : vector<1x1x32x32xbf16> to vector<32x32xbf16>
    %c0_43 = arith.constant 0 : index
    %c0_44 = arith.constant 0 : index
    %c0_45 = arith.constant 0 : index
    %c0_46 = arith.constant 0 : index
    %42 = vector.load %arg7[%c0_43, %c0_44, %c0_45, %c0_46] : memref<1x3x1x32xf32, #tpu.memory_space<vmem>>, vector<1x1x1x32xf32>
    %43 = vector.shape_cast %42 : vector<1x1x1x32xf32> to vector<1x32xf32>
    %c0_47 = arith.constant 0 : index
    %c1_48 = arith.constant 1 : index
    %c0_49 = arith.constant 0 : index
    %c0_50 = arith.constant 0 : index
    %44 = vector.load %arg7[%c0_47, %c1_48, %c0_49, %c0_50] : memref<1x3x1x32xf32, #tpu.memory_space<vmem>>, vector<1x1x1x32xf32>
    %45 = vector.shape_cast %44 : vector<1x1x1x32xf32> to vector<1x32xf32>
    %c0_51 = arith.constant 0 : index
    %c2_52 = arith.constant 2 : index
    %c0_53 = arith.constant 0 : index
    %c0_54 = arith.constant 0 : index
    %46 = vector.load %arg7[%c0_51, %c2_52, %c0_53, %c0_54] : memref<1x3x1x32xf32, #tpu.memory_space<vmem>>, vector<1x1x1x32xf32>
    %47 = vector.shape_cast %46 : vector<1x1x1x32xf32> to vector<1x32xf32>
    %c0_55 = arith.constant 0 : index
    %c0_56 = arith.constant 0 : index
    %c0_57 = arith.constant 0 : index
    %48 = vector.load %arg2[%c0_55, %c0_56, %c0_57] : memref<1x8x1xi32, #tpu.memory_space<vmem>>, vector<1x8x1xi32>
    %49 = vector.shape_cast %48 : vector<1x8x1xi32> to vector<8x1xi32>
    %cst_58 = arith.constant 0.000000e+00 : f32
    %50 = vector.broadcast %cst_58 : f32 to vector<8x32xf32>
    %51 = arith.truncf %50 : vector<8x32xf32> to vector<8x32xbf16>
    %cst_59 = arith.constant dense<0.000000e+00> : vector<8x32xf32>
    %52 = tpu.matmul %51, %37, %cst_59 {dimension_numbers = #tpu.dot_dimension_numbers<[1], [0], [0], [1], [0, 0, 1, 1], [], []>} : vector<8x32xbf16>, vector<32x32xbf16>, vector<8x32xf32> -> vector<8x32xf32>
    %53 = vector.broadcast %43 : vector<1x32xf32> to vector<8x32xf32>
    %54 = arith.addf %52, %53 : vector<8x32xf32>
    %cst_60 = arith.constant dense<0.000000e+00> : vector<8x32xf32>
    %55 = tpu.matmul %51, %39, %cst_60 {dimension_numbers = #tpu.dot_dimension_numbers<[1], [0], [0], [1], [0, 0, 1, 1], [], []>} : vector<8x32xbf16>, vector<32x32xbf16>, vector<8x32xf32> -> vector<8x32xf32>
    %56 = vector.broadcast %45 : vector<1x32xf32> to vector<8x32xf32>
    %57 = arith.addf %55, %56 : vector<8x32xf32>
    %cst_61 = arith.constant dense<0.000000e+00> : vector<8x32xf32>
    %58 = tpu.matmul %51, %41, %cst_61 {dimension_numbers = #tpu.dot_dimension_numbers<[1], [0], [0], [1], [0, 0, 1, 1], [], []>} : vector<8x32xbf16>, vector<32x32xbf16>, vector<8x32xf32> -> vector<8x32xf32>
    %59 = vector.broadcast %47 : vector<1x32xf32> to vector<8x32xf32>
    %60 = arith.addf %58, %59 : vector<8x32xf32>
    %61 = vector.extract_strided_slice %17 {offsets = [0, 0], sizes = [8, 32], strides = [1, 1]} : vector<64x32xf32> to vector<8x32xf32>
    %62 = arith.addf %61, %54 : vector<8x32xf32>
    %63 = arith.negf %62 : vector<8x32xf32>
    %64 = math.exp %63 : vector<8x32xf32>
    %cst_62 = arith.constant 1.000000e+00 : f32
    %65 = vector.broadcast %cst_62 : f32 to vector<8x32xf32>
    %66 = arith.addf %65, %64 : vector<8x32xf32>
    %67 = arith.divf %65, %66 : vector<8x32xf32>
    %68 = vector.extract_strided_slice %26 {offsets = [0, 0], sizes = [8, 32], strides = [1, 1]} : vector<64x32xf32> to vector<8x32xf32>
    %69 = arith.addf %68, %57 : vector<8x32xf32>
    %70 = arith.negf %69 : vector<8x32xf32>
    %71 = math.exp %70 : vector<8x32xf32>
    %cst_63 = arith.constant 1.000000e+00 : f32
    %72 = vector.broadcast %cst_63 : f32 to vector<8x32xf32>
    %73 = arith.addf %72, %71 : vector<8x32xf32>
    %74 = arith.divf %72, %73 : vector<8x32xf32>
    %75 = vector.extract_strided_slice %35 {offsets = [0, 0], sizes = [8, 32], strides = [1, 1]} : vector<64x32xf32> to vector<8x32xf32>
    %76 = arith.mulf %67, %60 : vector<8x32xf32>
    %77 = arith.addf %75, %76 : vector<8x32xf32>
    %78 = math.tanh %77 : vector<8x32xf32>
    %cst_64 = arith.constant 1.000000e+00 : f32
    %79 = vector.broadcast %cst_64 : f32 to vector<8x32xf32>
    %80 = arith.subf %79, %74 : vector<8x32xf32>
    %81 = arith.mulf %80, %78 : vector<8x32xf32>
    %82 = arith.mulf %74, %50 : vector<8x32xf32>
    %83 = arith.addf %81, %82 : vector<8x32xf32>
    %c0_i32 = arith.constant 0 : i32
    %84 = vector.broadcast %c0_i32 : i32 to vector<8x1xi32>
    %85 = arith.cmpi sgt, %49, %84 : vector<8x1xi32>
    %86 = vector.shape_cast %85 : vector<8x1xi1> to vector<8x1xi1>
    %87 = vector.broadcast %86 : vector<8x1xi1> to vector<8x32xi1>
    %88 = arith.select %87, %83, %50 : vector<8x32xi1>, vector<8x32xf32>
    %89 = arith.truncf %88 : vector<8x32xf32> to vector<8x32xbf16>
    %cst_65 = arith.constant dense<0.000000e+00> : vector<8x32xf32>
    %90 = tpu.matmul %89, %37, %cst_65 {dimension_numbers = #tpu.dot_dimension_numbers<[1], [0], [0], [1], [0, 0, 1, 1], [], []>} : vector<8x32xbf16>, vector<32x32xbf16>, vector<8x32xf32> -> vector<8x32xf32>
    %91 = vector.broadcast %43 : vector<1x32xf32> to vector<8x32xf32>
    %92 = arith.addf %90, %91 : vector<8x32xf32>
    %cst_66 = arith.constant dense<0.000000e+00> : vector<8x32xf32>
    %93 = tpu.matmul %89, %39, %cst_66 {dimension_numbers = #tpu.dot_dimension_numbers<[1], [0], [0], [1], [0, 0, 1, 1], [], []>} : vector<8x32xbf16>, vector<32x32xbf16>, vector<8x32xf32> -> vector<8x32xf32>
    %94 = vector.broadcast %45 : vector<1x32xf32> to vector<8x32xf32>
    %95 = arith.addf %93, %94 : vector<8x32xf32>
    %cst_67 = arith.constant dense<0.000000e+00> : vector<8x32xf32>
    %96 = tpu.matmul %89, %41, %cst_67 {dimension_numbers = #tpu.dot_dimension_numbers<[1], [0], [0], [1], [0, 0, 1, 1], [], []>} : vector<8x32xbf16>, vector<32x32xbf16>, vector<8x32xf32> -> vector<8x32xf32>
    %97 = vector.broadcast %47 : vector<1x32xf32> to vector<8x32xf32>
    %98 = arith.addf %96, %97 : vector<8x32xf32>
    %99 = vector.extract_strided_slice %17 {offsets = [8, 0], sizes = [8, 32], strides = [1, 1]} : vector<64x32xf32> to vector<8x32xf32>
    %100 = arith.addf %99, %92 : vector<8x32xf32>
    %101 = arith.negf %100 : vector<8x32xf32>
    %102 = math.exp %101 : vector<8x32xf32>
    %cst_68 = arith.constant 1.000000e+00 : f32
    %103 = vector.broadcast %cst_68 : f32 to vector<8x32xf32>
    %104 = arith.addf %103, %102 : vector<8x32xf32>
    %105 = arith.divf %103, %104 : vector<8x32xf32>
    %106 = vector.extract_strided_slice %26 {offsets = [8, 0], sizes = [8, 32], strides = [1, 1]} : vector<64x32xf32> to vector<8x32xf32>
    %107 = arith.addf %106, %95 : vector<8x32xf32>
    %108 = arith.negf %107 : vector<8x32xf32>
    %109 = math.exp %108 : vector<8x32xf32>
    %cst_69 = arith.constant 1.000000e+00 : f32
    %110 = vector.broadcast %cst_69 : f32 to vector<8x32xf32>
    %111 = arith.addf %110, %109 : vector<8x32xf32>
    %112 = arith.divf %110, %111 : vector<8x32xf32>
    %113 = vector.extract_strided_slice %35 {offsets = [8, 0], sizes = [8, 32], strides = [1, 1]} : vector<64x32xf32> to vector<8x32xf32>
    %114 = arith.mulf %105, %98 : vector<8x32xf32>
    %115 = arith.addf %113, %114 : vector<8x32xf32>
    %116 = math.tanh %115 : vector<8x32xf32>
    %cst_70 = arith.constant 1.000000e+00 : f32
    %117 = vector.broadcast %cst_70 : f32 to vector<8x32xf32>
    %118 = arith.subf %117, %112 : vector<8x32xf32>
    %119 = arith.mulf %118, %116 : vector<8x32xf32>
    %120 = arith.mulf %112, %88 : vector<8x32xf32>
    %121 = arith.addf %119, %120 : vector<8x32xf32>
    %c1_i32 = arith.constant 1 : i32
    %122 = vector.broadcast %c1_i32 : i32 to vector<8x1xi32>
    %123 = arith.cmpi sgt, %49, %122 : vector<8x1xi32>
    %124 = vector.shape_cast %123 : vector<8x1xi1> to vector<8x1xi1>
    %125 = vector.broadcast %124 : vector<8x1xi1> to vector<8x32xi1>
    %126 = arith.select %125, %121, %88 : vector<8x32xi1>, vector<8x32xf32>
    %127 = arith.truncf %126 : vector<8x32xf32> to vector<8x32xbf16>
    %cst_71 = arith.constant dense<0.000000e+00> : vector<8x32xf32>
    %128 = tpu.matmul %127, %37, %cst_71 {dimension_numbers = #tpu.dot_dimension_numbers<[1], [0], [0], [1], [0, 0, 1, 1], [], []>} : vector<8x32xbf16>, vector<32x32xbf16>, vector<8x32xf32> -> vector<8x32xf32>
    %129 = vector.broadcast %43 : vector<1x32xf32> to vector<8x32xf32>
    %130 = arith.addf %128, %129 : vector<8x32xf32>
    %cst_72 = arith.constant dense<0.000000e+00> : vector<8x32xf32>
    %131 = tpu.matmul %127, %39, %cst_72 {dimension_numbers = #tpu.dot_dimension_numbers<[1], [0], [0], [1], [0, 0, 1, 1], [], []>} : vector<8x32xbf16>, vector<32x32xbf16>, vector<8x32xf32> -> vector<8x32xf32>
    %132 = vector.broadcast %45 : vector<1x32xf32> to vector<8x32xf32>
    %133 = arith.addf %131, %132 : vector<8x32xf32>
    %cst_73 = arith.constant dense<0.000000e+00> : vector<8x32xf32>
    %134 = tpu.matmul %127, %41, %cst_73 {dimension_numbers = #tpu.dot_dimension_numbers<[1], [0], [0], [1], [0, 0, 1, 1], [], []>} : vector<8x32xbf16>, vector<32x32xbf16>, vector<8x32xf32> -> vector<8x32xf32>
    %135 = vector.broadcast %47 : vector<1x32xf32> to vector<8x32xf32>
    %136 = arith.addf %134, %135 : vector<8x32xf32>
    %137 = vector.extract_strided_slice %17 {offsets = [16, 0], sizes = [8, 32], strides = [1, 1]} : vector<64x32xf32> to vector<8x32xf32>
    %138 = arith.addf %137, %130 : vector<8x32xf32>
    %139 = arith.negf %138 : vector<8x32xf32>
    %140 = math.exp %139 : vector<8x32xf32>
    %cst_74 = arith.constant 1.000000e+00 : f32
    %141 = vector.broadcast %cst_74 : f32 to vector<8x32xf32>
    %142 = arith.addf %141, %140 : vector<8x32xf32>
    %143 = arith.divf %141, %142 : vector<8x32xf32>
    %144 = vector.extract_strided_slice %26 {offsets = [16, 0], sizes = [8, 32], strides = [1, 1]} : vector<64x32xf32> to vector<8x32xf32>
    %145 = arith.addf %144, %133 : vector<8x32xf32>
    %146 = arith.negf %145 : vector<8x32xf32>
    %147 = math.exp %146 : vector<8x32xf32>
    %cst_75 = arith.constant 1.000000e+00 : f32
    %148 = vector.broadcast %cst_75 : f32 to vector<8x32xf32>
    %149 = arith.addf %148, %147 : vector<8x32xf32>
    %150 = arith.divf %148, %149 : vector<8x32xf32>
    %151 = vector.extract_strided_slice %35 {offsets = [16, 0], sizes = [8, 32], strides = [1, 1]} : vector<64x32xf32> to vector<8x32xf32>
    %152 = arith.mulf %143, %136 : vector<8x32xf32>
    %153 = arith.addf %151, %152 : vector<8x32xf32>
    %154 = math.tanh %153 : vector<8x32xf32>
    %cst_76 = arith.constant 1.000000e+00 : f32
    %155 = vector.broadcast %cst_76 : f32 to vector<8x32xf32>
    %156 = arith.subf %155, %150 : vector<8x32xf32>
    %157 = arith.mulf %156, %154 : vector<8x32xf32>
    %158 = arith.mulf %150, %126 : vector<8x32xf32>
    %159 = arith.addf %157, %158 : vector<8x32xf32>
    %c2_i32 = arith.constant 2 : i32
    %160 = vector.broadcast %c2_i32 : i32 to vector<8x1xi32>
    %161 = arith.cmpi sgt, %49, %160 : vector<8x1xi32>
    %162 = vector.shape_cast %161 : vector<8x1xi1> to vector<8x1xi1>
    %163 = vector.broadcast %162 : vector<8x1xi1> to vector<8x32xi1>
    %164 = arith.select %163, %159, %126 : vector<8x32xi1>, vector<8x32xf32>
    %165 = arith.truncf %164 : vector<8x32xf32> to vector<8x32xbf16>
    %cst_77 = arith.constant dense<0.000000e+00> : vector<8x32xf32>
    %166 = tpu.matmul %165, %37, %cst_77 {dimension_numbers = #tpu.dot_dimension_numbers<[1], [0], [0], [1], [0, 0, 1, 1], [], []>} : vector<8x32xbf16>, vector<32x32xbf16>, vector<8x32xf32> -> vector<8x32xf32>
    %167 = vector.broadcast %43 : vector<1x32xf32> to vector<8x32xf32>
    %168 = arith.addf %166, %167 : vector<8x32xf32>
    %cst_78 = arith.constant dense<0.000000e+00> : vector<8x32xf32>
    %169 = tpu.matmul %165, %39, %cst_78 {dimension_numbers = #tpu.dot_dimension_numbers<[1], [0], [0], [1], [0, 0, 1, 1], [], []>} : vector<8x32xbf16>, vector<32x32xbf16>, vector<8x32xf32> -> vector<8x32xf32>
    %170 = vector.broadcast %45 : vector<1x32xf32> to vector<8x32xf32>
    %171 = arith.addf %169, %170 : vector<8x32xf32>
    %cst_79 = arith.constant dense<0.000000e+00> : vector<8x32xf32>
    %172 = tpu.matmul %165, %41, %cst_79 {dimension_numbers = #tpu.dot_dimension_numbers<[1], [0], [0], [1], [0, 0, 1, 1], [], []>} : vector<8x32xbf16>, vector<32x32xbf16>, vector<8x32xf32> -> vector<8x32xf32>
    %173 = vector.broadcast %47 : vector<1x32xf32> to vector<8x32xf32>
    %174 = arith.addf %172, %173 : vector<8x32xf32>
    %175 = vector.extract_strided_slice %17 {offsets = [24, 0], sizes = [8, 32], strides = [1, 1]} : vector<64x32xf32> to vector<8x32xf32>
    %176 = arith.addf %175, %168 : vector<8x32xf32>
    %177 = arith.negf %176 : vector<8x32xf32>
    %178 = math.exp %177 : vector<8x32xf32>
    %cst_80 = arith.constant 1.000000e+00 : f32
    %179 = vector.broadcast %cst_80 : f32 to vector<8x32xf32>
    %180 = arith.addf %179, %178 : vector<8x32xf32>
    %181 = arith.divf %179, %180 : vector<8x32xf32>
    %182 = vector.extract_strided_slice %26 {offsets = [24, 0], sizes = [8, 32], strides = [1, 1]} : vector<64x32xf32> to vector<8x32xf32>
    %183 = arith.addf %182, %171 : vector<8x32xf32>
    %184 = arith.negf %183 : vector<8x32xf32>
    %185 = math.exp %184 : vector<8x32xf32>
    %cst_81 = arith.constant 1.000000e+00 : f32
    %186 = vector.broadcast %cst_81 : f32 to vector<8x32xf32>
    %187 = arith.addf %186, %185 : vector<8x32xf32>
    %188 = arith.divf %186, %187 : vector<8x32xf32>
    %189 = vector.extract_strided_slice %35 {offsets = [24, 0], sizes = [8, 32], strides = [1, 1]} : vector<64x32xf32> to vector<8x32xf32>
    %190 = arith.mulf %181, %174 : vector<8x32xf32>
    %191 = arith.addf %189, %190 : vector<8x32xf32>
    %192 = math.tanh %191 : vector<8x32xf32>
    %cst_82 = arith.constant 1.000000e+00 : f32
    %193 = vector.broadcast %cst_82 : f32 to vector<8x32xf32>
    %194 = arith.subf %193, %188 : vector<8x32xf32>
    %195 = arith.mulf %194, %192 : vector<8x32xf32>
    %196 = arith.mulf %188, %164 : vector<8x32xf32>
    %197 = arith.addf %195, %196 : vector<8x32xf32>
    %c3_i32 = arith.constant 3 : i32
    %198 = vector.broadcast %c3_i32 : i32 to vector<8x1xi32>
    %199 = arith.cmpi sgt, %49, %198 : vector<8x1xi32>
    %200 = vector.shape_cast %199 : vector<8x1xi1> to vector<8x1xi1>
    %201 = vector.broadcast %200 : vector<8x1xi1> to vector<8x32xi1>
    %202 = arith.select %201, %197, %164 : vector<8x32xi1>, vector<8x32xf32>
    %203 = arith.truncf %202 : vector<8x32xf32> to vector<8x32xbf16>
    %cst_83 = arith.constant dense<0.000000e+00> : vector<8x32xf32>
    %204 = tpu.matmul %203, %37, %cst_83 {dimension_numbers = #tpu.dot_dimension_numbers<[1], [0], [0], [1], [0, 0, 1, 1], [], []>} : vector<8x32xbf16>, vector<32x32xbf16>, vector<8x32xf32> -> vector<8x32xf32>
    %205 = vector.broadcast %43 : vector<1x32xf32> to vector<8x32xf32>
    %206 = arith.addf %204, %205 : vector<8x32xf32>
    %cst_84 = arith.constant dense<0.000000e+00> : vector<8x32xf32>
    %207 = tpu.matmul %203, %39, %cst_84 {dimension_numbers = #tpu.dot_dimension_numbers<[1], [0], [0], [1], [0, 0, 1, 1], [], []>} : vector<8x32xbf16>, vector<32x32xbf16>, vector<8x32xf32> -> vector<8x32xf32>
    %208 = vector.broadcast %45 : vector<1x32xf32> to vector<8x32xf32>
    %209 = arith.addf %207, %208 : vector<8x32xf32>
    %cst_85 = arith.constant dense<0.000000e+00> : vector<8x32xf32>
    %210 = tpu.matmul %203, %41, %cst_85 {dimension_numbers = #tpu.dot_dimension_numbers<[1], [0], [0], [1], [0, 0, 1, 1], [], []>} : vector<8x32xbf16>, vector<32x32xbf16>, vector<8x32xf32> -> vector<8x32xf32>
    %211 = vector.broadcast %47 : vector<1x32xf32> to vector<8x32xf32>
    %212 = arith.addf %210, %211 : vector<8x32xf32>
    %213 = vector.extract_strided_slice %17 {offsets = [32, 0], sizes = [8, 32], strides = [1, 1]} : vector<64x32xf32> to vector<8x32xf32>
    %214 = arith.addf %213, %206 : vector<8x32xf32>
    %215 = arith.negf %214 : vector<8x32xf32>
    %216 = math.exp %215 : vector<8x32xf32>
    %cst_86 = arith.constant 1.000000e+00 : f32
    %217 = vector.broadcast %cst_86 : f32 to vector<8x32xf32>
    %218 = arith.addf %217, %216 : vector<8x32xf32>
    %219 = arith.divf %217, %218 : vector<8x32xf32>
    %220 = vector.extract_strided_slice %26 {offsets = [32, 0], sizes = [8, 32], strides = [1, 1]} : vector<64x32xf32> to vector<8x32xf32>
    %221 = arith.addf %220, %209 : vector<8x32xf32>
    %222 = arith.negf %221 : vector<8x32xf32>
    %223 = math.exp %222 : vector<8x32xf32>
    %cst_87 = arith.constant 1.000000e+00 : f32
    %224 = vector.broadcast %cst_87 : f32 to vector<8x32xf32>
    %225 = arith.addf %224, %223 : vector<8x32xf32>
    %226 = arith.divf %224, %225 : vector<8x32xf32>
    %227 = vector.extract_strided_slice %35 {offsets = [32, 0], sizes = [8, 32], strides = [1, 1]} : vector<64x32xf32> to vector<8x32xf32>
    %228 = arith.mulf %219, %212 : vector<8x32xf32>
    %229 = arith.addf %227, %228 : vector<8x32xf32>
    %230 = math.tanh %229 : vector<8x32xf32>
    %cst_88 = arith.constant 1.000000e+00 : f32
    %231 = vector.broadcast %cst_88 : f32 to vector<8x32xf32>
    %232 = arith.subf %231, %226 : vector<8x32xf32>
    %233 = arith.mulf %232, %230 : vector<8x32xf32>
    %234 = arith.mulf %226, %202 : vector<8x32xf32>
    %235 = arith.addf %233, %234 : vector<8x32xf32>
    %c4_i32 = arith.constant 4 : i32
    %236 = vector.broadcast %c4_i32 : i32 to vector<8x1xi32>
    %237 = arith.cmpi sgt, %49, %236 : vector<8x1xi32>
    %238 = vector.shape_cast %237 : vector<8x1xi1> to vector<8x1xi1>
    %239 = vector.broadcast %238 : vector<8x1xi1> to vector<8x32xi1>
    %240 = arith.select %239, %235, %202 : vector<8x32xi1>, vector<8x32xf32>
    %241 = arith.truncf %240 : vector<8x32xf32> to vector<8x32xbf16>
    %cst_89 = arith.constant dense<0.000000e+00> : vector<8x32xf32>
    %242 = tpu.matmul %241, %37, %cst_89 {dimension_numbers = #tpu.dot_dimension_numbers<[1], [0], [0], [1], [0, 0, 1, 1], [], []>} : vector<8x32xbf16>, vector<32x32xbf16>, vector<8x32xf32> -> vector<8x32xf32>
    %243 = vector.broadcast %43 : vector<1x32xf32> to vector<8x32xf32>
    %244 = arith.addf %242, %243 : vector<8x32xf32>
    %cst_90 = arith.constant dense<0.000000e+00> : vector<8x32xf32>
    %245 = tpu.matmul %241, %39, %cst_90 {dimension_numbers = #tpu.dot_dimension_numbers<[1], [0], [0], [1], [0, 0, 1, 1], [], []>} : vector<8x32xbf16>, vector<32x32xbf16>, vector<8x32xf32> -> vector<8x32xf32>
    %246 = vector.broadcast %45 : vector<1x32xf32> to vector<8x32xf32>
    %247 = arith.addf %245, %246 : vector<8x32xf32>
    %cst_91 = arith.constant dense<0.000000e+00> : vector<8x32xf32>
    %248 = tpu.matmul %241, %41, %cst_91 {dimension_numbers = #tpu.dot_dimension_numbers<[1], [0], [0], [1], [0, 0, 1, 1], [], []>} : vector<8x32xbf16>, vector<32x32xbf16>, vector<8x32xf32> -> vector<8x32xf32>
    %249 = vector.broadcast %47 : vector<1x32xf32> to vector<8x32xf32>
    %250 = arith.addf %248, %249 : vector<8x32xf32>
    %251 = vector.extract_strided_slice %17 {offsets = [40, 0], sizes = [8, 32], strides = [1, 1]} : vector<64x32xf32> to vector<8x32xf32>
    %252 = arith.addf %251, %244 : vector<8x32xf32>
    %253 = arith.negf %252 : vector<8x32xf32>
    %254 = math.exp %253 : vector<8x32xf32>
    %cst_92 = arith.constant 1.000000e+00 : f32
    %255 = vector.broadcast %cst_92 : f32 to vector<8x32xf32>
    %256 = arith.addf %255, %254 : vector<8x32xf32>
    %257 = arith.divf %255, %256 : vector<8x32xf32>
    %258 = vector.extract_strided_slice %26 {offsets = [40, 0], sizes = [8, 32], strides = [1, 1]} : vector<64x32xf32> to vector<8x32xf32>
    %259 = arith.addf %258, %247 : vector<8x32xf32>
    %260 = arith.negf %259 : vector<8x32xf32>
    %261 = math.exp %260 : vector<8x32xf32>
    %cst_93 = arith.constant 1.000000e+00 : f32
    %262 = vector.broadcast %cst_93 : f32 to vector<8x32xf32>
    %263 = arith.addf %262, %261 : vector<8x32xf32>
    %264 = arith.divf %262, %263 : vector<8x32xf32>
    %265 = vector.extract_strided_slice %35 {offsets = [40, 0], sizes = [8, 32], strides = [1, 1]} : vector<64x32xf32> to vector<8x32xf32>
    %266 = arith.mulf %257, %250 : vector<8x32xf32>
    %267 = arith.addf %265, %266 : vector<8x32xf32>
    %268 = math.tanh %267 : vector<8x32xf32>
    %cst_94 = arith.constant 1.000000e+00 : f32
    %269 = vector.broadcast %cst_94 : f32 to vector<8x32xf32>
    %270 = arith.subf %269, %264 : vector<8x32xf32>
    %271 = arith.mulf %270, %268 : vector<8x32xf32>
    %272 = arith.mulf %264, %240 : vector<8x32xf32>
    %273 = arith.addf %271, %272 : vector<8x32xf32>
    %c5_i32 = arith.constant 5 : i32
    %274 = vector.broadcast %c5_i32 : i32 to vector<8x1xi32>
    %275 = arith.cmpi sgt, %49, %274 : vector<8x1xi32>
    %276 = vector.shape_cast %275 : vector<8x1xi1> to vector<8x1xi1>
    %277 = vector.broadcast %276 : vector<8x1xi1> to vector<8x32xi1>
    %278 = arith.select %277, %273, %240 : vector<8x32xi1>, vector<8x32xf32>
    %279 = arith.truncf %278 : vector<8x32xf32> to vector<8x32xbf16>
    %cst_95 = arith.constant dense<0.000000e+00> : vector<8x32xf32>
    %280 = tpu.matmul %279, %37, %cst_95 {dimension_numbers = #tpu.dot_dimension_numbers<[1], [0], [0], [1], [0, 0, 1, 1], [], []>} : vector<8x32xbf16>, vector<32x32xbf16>, vector<8x32xf32> -> vector<8x32xf32>
    %281 = vector.broadcast %43 : vector<1x32xf32> to vector<8x32xf32>
    %282 = arith.addf %280, %281 : vector<8x32xf32>
    %cst_96 = arith.constant dense<0.000000e+00> : vector<8x32xf32>
    %283 = tpu.matmul %279, %39, %cst_96 {dimension_numbers = #tpu.dot_dimension_numbers<[1], [0], [0], [1], [0, 0, 1, 1], [], []>} : vector<8x32xbf16>, vector<32x32xbf16>, vector<8x32xf32> -> vector<8x32xf32>
    %284 = vector.broadcast %45 : vector<1x32xf32> to vector<8x32xf32>
    %285 = arith.addf %283, %284 : vector<8x32xf32>
    %cst_97 = arith.constant dense<0.000000e+00> : vector<8x32xf32>
    %286 = tpu.matmul %279, %41, %cst_97 {dimension_numbers = #tpu.dot_dimension_numbers<[1], [0], [0], [1], [0, 0, 1, 1], [], []>} : vector<8x32xbf16>, vector<32x32xbf16>, vector<8x32xf32> -> vector<8x32xf32>
    %287 = vector.broadcast %47 : vector<1x32xf32> to vector<8x32xf32>
    %288 = arith.addf %286, %287 : vector<8x32xf32>
    %289 = vector.extract_strided_slice %17 {offsets = [48, 0], sizes = [8, 32], strides = [1, 1]} : vector<64x32xf32> to vector<8x32xf32>
    %290 = arith.addf %289, %282 : vector<8x32xf32>
    %291 = arith.negf %290 : vector<8x32xf32>
    %292 = math.exp %291 : vector<8x32xf32>
    %cst_98 = arith.constant 1.000000e+00 : f32
    %293 = vector.broadcast %cst_98 : f32 to vector<8x32xf32>
    %294 = arith.addf %293, %292 : vector<8x32xf32>
    %295 = arith.divf %293, %294 : vector<8x32xf32>
    %296 = vector.extract_strided_slice %26 {offsets = [48, 0], sizes = [8, 32], strides = [1, 1]} : vector<64x32xf32> to vector<8x32xf32>
    %297 = arith.addf %296, %285 : vector<8x32xf32>
    %298 = arith.negf %297 : vector<8x32xf32>
    %299 = math.exp %298 : vector<8x32xf32>
    %cst_99 = arith.constant 1.000000e+00 : f32
    %300 = vector.broadcast %cst_99 : f32 to vector<8x32xf32>
    %301 = arith.addf %300, %299 : vector<8x32xf32>
    %302 = arith.divf %300, %301 : vector<8x32xf32>
    %303 = vector.extract_strided_slice %35 {offsets = [48, 0], sizes = [8, 32], strides = [1, 1]} : vector<64x32xf32> to vector<8x32xf32>
    %304 = arith.mulf %295, %288 : vector<8x32xf32>
    %305 = arith.addf %303, %304 : vector<8x32xf32>
    %306 = math.tanh %305 : vector<8x32xf32>
    %cst_100 = arith.constant 1.000000e+00 : f32
    %307 = vector.broadcast %cst_100 : f32 to vector<8x32xf32>
    %308 = arith.subf %307, %302 : vector<8x32xf32>
    %309 = arith.mulf %308, %306 : vector<8x32xf32>
    %310 = arith.mulf %302, %278 : vector<8x32xf32>
    %311 = arith.addf %309, %310 : vector<8x32xf32>
    %c6_i32 = arith.constant 6 : i32
    %312 = vector.broadcast %c6_i32 : i32 to vector<8x1xi32>
    %313 = arith.cmpi sgt, %49, %312 : vector<8x1xi32>
    %314 = vector.shape_cast %313 : vector<8x1xi1> to vector<8x1xi1>
    %315 = vector.broadcast %314 : vector<8x1xi1> to vector<8x32xi1>
    %316 = arith.select %315, %311, %278 : vector<8x32xi1>, vector<8x32xf32>
    %317 = arith.truncf %316 : vector<8x32xf32> to vector<8x32xbf16>
    %cst_101 = arith.constant dense<0.000000e+00> : vector<8x32xf32>
    %318 = tpu.matmul %317, %37, %cst_101 {dimension_numbers = #tpu.dot_dimension_numbers<[1], [0], [0], [1], [0, 0, 1, 1], [], []>} : vector<8x32xbf16>, vector<32x32xbf16>, vector<8x32xf32> -> vector<8x32xf32>
    %319 = vector.broadcast %43 : vector<1x32xf32> to vector<8x32xf32>
    %320 = arith.addf %318, %319 : vector<8x32xf32>
    %cst_102 = arith.constant dense<0.000000e+00> : vector<8x32xf32>
    %321 = tpu.matmul %317, %39, %cst_102 {dimension_numbers = #tpu.dot_dimension_numbers<[1], [0], [0], [1], [0, 0, 1, 1], [], []>} : vector<8x32xbf16>, vector<32x32xbf16>, vector<8x32xf32> -> vector<8x32xf32>
    %322 = vector.broadcast %45 : vector<1x32xf32> to vector<8x32xf32>
    %323 = arith.addf %321, %322 : vector<8x32xf32>
    %cst_103 = arith.constant dense<0.000000e+00> : vector<8x32xf32>
    %324 = tpu.matmul %317, %41, %cst_103 {dimension_numbers = #tpu.dot_dimension_numbers<[1], [0], [0], [1], [0, 0, 1, 1], [], []>} : vector<8x32xbf16>, vector<32x32xbf16>, vector<8x32xf32> -> vector<8x32xf32>
    %325 = vector.broadcast %47 : vector<1x32xf32> to vector<8x32xf32>
    %326 = arith.addf %324, %325 : vector<8x32xf32>
    %327 = vector.extract_strided_slice %17 {offsets = [56, 0], sizes = [8, 32], strides = [1, 1]} : vector<64x32xf32> to vector<8x32xf32>
    %328 = arith.addf %327, %320 : vector<8x32xf32>
    %329 = arith.negf %328 : vector<8x32xf32>
    %330 = math.exp %329 : vector<8x32xf32>
    %cst_104 = arith.constant 1.000000e+00 : f32
    %331 = vector.broadcast %cst_104 : f32 to vector<8x32xf32>
    %332 = arith.addf %331, %330 : vector<8x32xf32>
    %333 = arith.divf %331, %332 : vector<8x32xf32>
    %334 = vector.extract_strided_slice %26 {offsets = [56, 0], sizes = [8, 32], strides = [1, 1]} : vector<64x32xf32> to vector<8x32xf32>
    %335 = arith.addf %334, %323 : vector<8x32xf32>
    %336 = arith.negf %335 : vector<8x32xf32>
    %337 = math.exp %336 : vector<8x32xf32>
    %cst_105 = arith.constant 1.000000e+00 : f32
    %338 = vector.broadcast %cst_105 : f32 to vector<8x32xf32>
    %339 = arith.addf %338, %337 : vector<8x32xf32>
    %340 = arith.divf %338, %339 : vector<8x32xf32>
    %341 = vector.extract_strided_slice %35 {offsets = [56, 0], sizes = [8, 32], strides = [1, 1]} : vector<64x32xf32> to vector<8x32xf32>
    %342 = arith.mulf %333, %326 : vector<8x32xf32>
    %343 = arith.addf %341, %342 : vector<8x32xf32>
    %344 = math.tanh %343 : vector<8x32xf32>
    %cst_106 = arith.constant 1.000000e+00 : f32
    %345 = vector.broadcast %cst_106 : f32 to vector<8x32xf32>
    %346 = arith.subf %345, %340 : vector<8x32xf32>
    %347 = arith.mulf %346, %344 : vector<8x32xf32>
    %348 = arith.mulf %340, %316 : vector<8x32xf32>
    %349 = arith.addf %347, %348 : vector<8x32xf32>
    %c7_i32 = arith.constant 7 : i32
    %350 = vector.broadcast %c7_i32 : i32 to vector<8x1xi32>
    %351 = arith.cmpi sgt, %49, %350 : vector<8x1xi32>
    %352 = vector.shape_cast %351 : vector<8x1xi1> to vector<8x1xi1>
    %353 = vector.broadcast %352 : vector<8x1xi1> to vector<8x32xi1>
    %354 = arith.select %353, %349, %316 : vector<8x32xi1>, vector<8x32xf32>
    %c0_107 = arith.constant 0 : index
    %c0_108 = arith.constant 0 : index
    %c0_109 = arith.constant 0 : index
    %355 = vector.load %arg8[%c0_107, %c0_108, %c0_109] : memref<1x8x32xf32, #tpu.memory_space<vmem>>, vector<1x8x32xf32>
    %356 = vector.shape_cast %355 : vector<1x8x32xf32> to vector<8x32xf32>
    %357 = vector.shape_cast %354 : vector<8x32xf32> to vector<1x8x32xf32>
    tpu.vector_store %arg8[%c0_107, %c0_108, %c0_109], %357 {strides = array<i32>} : memref<1x8x32xf32, #tpu.memory_space<vmem>>, vector<1x8x32xf32>,
    return
  }
  func.func @transform_0(%arg0: i32) -> (i32, i32, i32) {
    %c0_i32 = arith.constant 0 : i32
    %c0_i32_0 = arith.constant 0 : i32
    %c0_i32_1 = arith.constant 0 : i32
    return %arg0, %c0_i32, %c0_i32_0 : i32, i32, i32
  }
  func.func @transform_1(%arg0: i32) -> (i32, i32, i32) {
    %c0_i32 = arith.constant 0 : i32
    %c0_i32_0 = arith.constant 0 : i32
    %c0_i32_1 = arith.constant 0 : i32
    return %arg0, %c0_i32, %c0_i32_0 : i32, i32, i32
  }
  func.func @transform_2(%arg0: i32) -> (i32, i32) {
    %c0_i32 = arith.constant 0 : i32
    %c0_i32_0 = arith.constant 0 : i32
    %c0_i32_1 = arith.constant 0 : i32
    return %c0_i32, %c0_i32_0 : i32, i32
  }
  func.func @transform_3(%arg0: i32) -> (i32, i32, i32, i32) {
    %c0_i32 = arith.constant 0 : i32
    %c0_i32_0 = arith.constant 0 : i32
    %c0_i32_1 = arith.constant 0 : i32
    %c0_i32_2 = arith.constant 0 : i32
    return %arg0, %c0_i32, %c0_i32_0, %c0_i32_1 : i32, i32, i32, i32
  }
  func.func @transform_4(%arg0: i32) -> (i32, i32, i32, i32) {
    %c0_i32 = arith.constant 0 : i32
    %c0_i32_0 = arith.constant 0 : i32
    %c0_i32_1 = arith.constant 0 : i32
    %c0_i32_2 = arith.constant 0 : i32
    return %arg0, %c0_i32, %c0_i32_0, %c0_i32_1 : i32, i32, i32, i32
  }
  func.func @transform_5(%arg0: i32) -> (i32, i32, i32, i32) {
    %c0_i32 = arith.constant 0 : i32
    %c0_i32_0 = arith.constant 0 : i32
    %c0_i32_1 = arith.constant 0 : i32
    %c0_i32_2 = arith.constant 0 : i32
    return %arg0, %c0_i32, %c0_i32_0, %c0_i32_1 : i32, i32, i32, i32
  }
  func.func @transform_6(%arg0: i32) -> (i32, i32, i32, i32) {
    %c0_i32 = arith.constant 0 : i32
    %c0_i32_0 = arith.constant 0 : i32
    %c0_i32_1 = arith.constant 0 : i32
    %c0_i32_2 = arith.constant 0 : i32
    return %arg0, %c0_i32, %c0_i32_0, %c0_i32_1 : i32, i32, i32, i32
  }
  func.func @transform_7(%arg0: i32) -> (i32, i32, i32) {
    %c0_i32 = arith.constant 0 : i32
    %c0_i32_0 = arith.constant 0 : i32
    %c0_i32_1 = arith.constant 0 : i32
    return %arg0, %c0_i32, %c0_i32_0 : i32, i32, i32
  }
}

module attributes {stable_mosaic.version = 11 : i64} {
  func.func @_mlp_kernel(%arg0: i32, %arg1: memref<8x128xf32, #tpu.memory_space<vmem>>, %arg2: memref<128x32xbf16, #tpu.memory_space<vmem>>, %arg3: memref<1x32xf32, #tpu.memory_space<vmem>>, %arg4: memref<1x32xf32, #tpu.memory_space<vmem>>, %arg5: memref<1x1xf32, #tpu.memory_space<vmem>>, %arg6: memref<8x1xf32, #tpu.memory_space<vmem>>) attributes {dimension_semantics = [#tpu.dimension_semantics<arbitrary>], iteration_bounds = array<i64: 1>, scalar_prefetch = 0 : i64, scratch_operands = 0 : i64, tpu.core_type = #tpu.core_type<tc>, window_params = [{pipeline_mode = #tpu.pipeline_mode<synchronous>, transform_indices = @transform_0, window_bounds = array<i64: 8, 128>}, {pipeline_mode = #tpu.pipeline_mode<synchronous>, transform_indices = @transform_1, window_bounds = array<i64: 128, 32>}, {pipeline_mode = #tpu.pipeline_mode<synchronous>, transform_indices = @transform_2, window_bounds = array<i64: 1, 32>}, {pipeline_mode = #tpu.pipeline_mode<synchronous>, transform_indices = @transform_3, window_bounds = array<i64: 1, 32>}, {pipeline_mode = #tpu.pipeline_mode<synchronous>, transform_indices = @transform_4, window_bounds = array<i64: 1, 1>}, {pipeline_mode = #tpu.pipeline_mode<synchronous>, transform_indices = @transform_5, window_bounds = array<i64: 8, 1>}]} {
    %c0 = arith.constant 0 : index
    %c0_0 = arith.constant 0 : index
    %0 = vector.load %arg1[%c0, %c0_0] : memref<8x128xf32, #tpu.memory_space<vmem>>, vector<8x128xf32>
    %1 = arith.truncf %0 : vector<8x128xf32> to vector<8x128xbf16>
    %c0_1 = arith.constant 0 : index
    %c0_2 = arith.constant 0 : index
    %2 = vector.load %arg2[%c0_1, %c0_2] : memref<128x32xbf16, #tpu.memory_space<vmem>>, vector<128x32xbf16>
    %cst = arith.constant dense<0.000000e+00> : vector<8x32xf32>
    %3 = tpu.matmul %1, %2, %cst {dimension_numbers = #tpu.dot_dimension_numbers<[1], [0], [0], [1], [0, 0, 1, 1], [], []>} : vector<8x128xbf16>, vector<128x32xbf16>, vector<8x32xf32> -> vector<8x32xf32>
    %c0_3 = arith.constant 0 : index
    %c0_4 = arith.constant 0 : index
    %4 = vector.load %arg3[%c0_3, %c0_4] : memref<1x32xf32, #tpu.memory_space<vmem>>, vector<1x32xf32>
    %5 = vector.broadcast %4 : vector<1x32xf32> to vector<8x32xf32>
    %6 = arith.addf %3, %5 : vector<8x32xf32>
    %cst_5 = arith.constant 0.000000e+00 : f32
    %7 = vector.broadcast %cst_5 : f32 to vector<8x32xf32>
    %8 = arith.maximumf %6, %7 : vector<8x32xf32>
    %c0_6 = arith.constant 0 : index
    %c0_7 = arith.constant 0 : index
    %9 = vector.load %arg4[%c0_6, %c0_7] : memref<1x32xf32, #tpu.memory_space<vmem>>, vector<1x32xf32>
    %10 = vector.broadcast %9 : vector<1x32xf32> to vector<8x32xf32>
    %11 = arith.mulf %8, %10 : vector<8x32xf32>
    %cst_8 = arith.constant dense<0.000000e+00> : vector<8xf32>
    %12 = vector.multi_reduction <add>, %11, %cst_8 [1] : vector<8x32xf32> to vector<8xf32>
    %13 = vector.shape_cast %12 : vector<8xf32> to vector<8x1xf32>
    %c0_9 = arith.constant 0 : index
    %c0_10 = arith.constant 0 : index
    %14 = vector.load %arg5[%c0_9, %c0_10] : memref<1x1xf32, #tpu.memory_space<vmem>>, vector<1x1xf32>
    %15 = vector.broadcast %14 : vector<1x1xf32> to vector<8x1xf32>
    %16 = arith.addf %13, %15 : vector<8x1xf32>
    %c0_11 = arith.constant 0 : index
    %c0_12 = arith.constant 0 : index
    %17 = vector.load %arg6[%c0_11, %c0_12] : memref<8x1xf32, #tpu.memory_space<vmem>>, vector<8x1xf32>
    tpu.vector_store %arg6[%c0_11, %c0_12], %16 {strides = array<i32>} : memref<8x1xf32, #tpu.memory_space<vmem>>, vector<8x1xf32>,
    return
  }
  func.func @transform_0(%arg0: i32) -> (i32, i32) {
    %c0_i32 = arith.constant 0 : i32
    %c0_i32_0 = arith.constant 0 : i32
    %c0_i32_1 = arith.constant 0 : i32
    return %c0_i32, %c0_i32_0 : i32, i32
  }
  func.func @transform_1(%arg0: i32) -> (i32, i32) {
    %c0_i32 = arith.constant 0 : i32
    %c0_i32_0 = arith.constant 0 : i32
    %c0_i32_1 = arith.constant 0 : i32
    return %c0_i32, %c0_i32_0 : i32, i32
  }
  func.func @transform_2(%arg0: i32) -> (i32, i32) {
    %c0_i32 = arith.constant 0 : i32
    %c0_i32_0 = arith.constant 0 : i32
    %c0_i32_1 = arith.constant 0 : i32
    return %c0_i32, %c0_i32_0 : i32, i32
  }
  func.func @transform_3(%arg0: i32) -> (i32, i32) {
    %c0_i32 = arith.constant 0 : i32
    %c0_i32_0 = arith.constant 0 : i32
    %c0_i32_1 = arith.constant 0 : i32
    return %c0_i32, %c0_i32_0 : i32, i32
  }
  func.func @transform_4(%arg0: i32) -> (i32, i32) {
    %c0_i32 = arith.constant 0 : i32
    %c0_i32_0 = arith.constant 0 : i32
    %c0_i32_1 = arith.constant 0 : i32
    return %c0_i32, %c0_i32_0 : i32, i32
  }
  func.func @transform_5(%arg0: i32) -> (i32, i32) {
    %c0_i32 = arith.constant 0 : i32
    %c0_i32_0 = arith.constant 0 : i32
    %c0_i32_1 = arith.constant 0 : i32
    return %c0_i32, %c0_i32_0 : i32, i32
  }
}

</mosaic_0001>

<bundles_post_ra>
// kernel: _device_forward.3
= control target key start
LH: loop header
LB: loop body
LE: loop exit
PB: predicated region body
PF: predicated region fallthrough
CT: control target
= control target key end

     0   :  { %vm111_vm0 = vcmask 261120   ;;  %vm120_vm1 = vcmask 7168   ;;  %s238_s1 = inlined_call_operand.vmem [shape: bf16[128,32], index: 1, kind: input, shape index: {}]   ;;  %s239_s2 = inlined_call_operand.vmem [shape: f32[1,32], index: 2, kind: input, shape index: {}]   ;;  %s240_s0 = inlined_call_operand.vmem [shape: f32[8,128], index: 0, kind: input, shape index: {}]   ;;  %s241_s3 = inlined_call_operand.vmem [shape: f32[1,32], index: 3, kind: input, shape index: {}]   ;;  %s242_s4 = inlined_call_operand.<no memory space> [shape: f32[1,1], index: 4, kind: input, shape index: {}]   ;;  %s243_s5 = inlined_call_operand.vmem [shape: f32[8,1], index: 5, kind: output, shape index: {}]  }
   0x1   :  { %v165_v0 = vld [vmem:[%s238_s1 + $0x38] sm:$0xff]  ;;  %v164_v1 = vld [vmem:[%s238_s1 + $0x30] sm:$0xff]  ;;  %v163_v2 = vld [vmem:[%s238_s1 + $0x28] sm:$0xff]  ;;  %v10_v10 = vstv %s242_s4 }
   0x2   :  { %92 = vmatpush.bf16.msra.mxu0 %v165_v0  ;;  %v162_v3 = vld [vmem:[%s238_s1 + $0x20] sm:$0xff]  ;;  %v161_v4 = vld [vmem:[%s238_s1 + $0x18] sm:$0xff]  ;;  %v160_v5 = vld [vmem:[%s238_s1 + $0x10] sm:$0xff]  ;;  %11 = vst [vmem:[#allocation2] sm:$0x1] %v10_v10 }
   0x3   :  { %v159_v6 = vld [vmem:[%s238_s1 + $0x8] sm:$0xff]  ;;  %v158_v7 = vld [vmem:[%s238_s1] sm:$0xff] }
   0x4   :  { %v22_v8 = vld [vmem:[%s240_s0] sm:$0xff] }
   0x5   :  { %v23_v9 = vpack.c.bf16 %v22_v8, %v22_v8  ;;  %v166_v11 = vld [vmem:[%s239_s2] ss:$0 sm:$0xff] }
   0x6   :  { %93 = vmatpush.bf16.msra.mxu0 %v164_v1  ;;  %v167_v14 = vld [vmem:[%s241_s3] ss:$0 sm:$0xff] }
   0x9   :  { %v168_v19 = vld [vmem:[#allocation2] ss:$0 sm:$0xff] }
   0xa   :  { %94 = vmatpush.bf16.msra.mxu0 %v163_v2 }
   0xe   :  { %95 = vmatpush.bf16.msra.mxu0 %v162_v3 }
  0x12   :  { %96 = vmatpush.bf16.msra.mxu0 %v161_v4 }
  0x16   :  { %97 = vmatpush.bf16.msra.mxu0 %v160_v5 }
  0x1a   :  { %98 = vmatpush.bf16.msra.mxu0 %v159_v6 }
  0x1e   :  { %99 = vmatpush.bf16.msra.mxu0 %v158_v7 }
  0x21   :  { %100 = vmatmul.bf16.vlgmr.msra.gmra.mxu0 %v23_v9 }
  0x9e   :  { %v101_v12 = vpop.f32.mrf.mxu0 }
  0x9f   :  { %v102_v13 = vadd.f32 %v166_v11, %v101_v12 }
  0xa1   :  { %v105_v15 = vmax.f32 %v102_v13, 0.0 }
  0xa3   :  { %v110_v16 = vmul.f32 %v167_v14, %v105_v15 }
  0xa5   :  { %v112_v17 = vsel %vm111_vm0, %v110_v16, 0.0 }
  0xa6   :  { %v103_v18 = vpop.f32.mrf.mxu0  ;;  %113 = vadd.xlane.f32.xlu0 %v112_v17 }
 0x119   :  { %v114_v20 = vpop.xlane.xlu0 %113 }
 0x11a   :  { %v119_v21 = vadd.f32 %v168_v19, %v114_v20 }
 0x11c   :  { %121 = vst.msk [vmem:[%s243_s5] sm:$0xff] %vm120_vm1, %v119_v21 }

// kernel: _device_forward.2
= control target key start
LH: loop header
LB: loop body
LE: loop exit
PB: predicated region body
PF: predicated region fallthrough
CT: control target
= control target key end

     0   :  { %12 = vsyncpa [#allocation3], 0  ;;  %s2551_s0 = inlined_call_operand.vmem [shape: s32[4,64,1], index: 0, kind: input, shape index: {}]   ;;  %s2552_s1 = inlined_call_operand.vmem [shape: s32[4,8,1], index: 1, kind: input, shape index: {}]   ;;  %s2553_s2 = inlined_call_operand.vmem [shape: bf16[50,16], index: 2, kind: input, shape index: {}]   ;;  %s2554_s3 = inlined_call_operand.hbm [shape: bf16[4,3,16,32], index: 3, kind: input, shape index: {}]   ;;  %s2555_s4 = inlined_call_operand.vmem [shape: bf16[4,3,32,32], index: 4, kind: input, shape index: {}]   ;;  %s2556_s5 = inlined_call_operand.vmem [shape: f32[4,3,1,32], index: 5, kind: input, shape index: {}]   ;;  %s2557_s6 = inlined_call_operand.vmem [shape: f32[4,3,1,32], index: 6, kind: input, shape index: {}]   ;;  %s2558_s7 = inlined_call_operand.vmem [shape: f32[4,8,32], index: 7, kind: output, shape index: {}]  }
   0x1   :  { %14 = vsyncpa [#allocation3 + $0x1], 0  ;;  %s2109_s24 = smov 0   ;;  %s2111_s25 = smov 0  }
   0x2   :  { %s2113_s26 = smov 0   ;;  %s2115_s27 = smov 0  }
   0x3 LB: > { %s2128_s28 = sadd.s32 4294967295, %s2063_s27   ;;  %s2131_s29 = sadd.s32 1, %s2063_s27   ;;  %s2063_s27 = sphi %s2115_s27, %s2564_s27   ;;  %s2059_s26 = sphi %s2113_s26, %s2563_s26   ;;  %s2055_s25 = sphi %s2111_s25, %s2562_s25   ;;  %s2051_s24 = sphi %s2109_s24, %s2561_s24  }
   0x4   : > { %s97_s30 = ssub.s32 %s2063_s27, %s2131_s29  ;;  %s100_s8 = sadd.s32 1, %s2059_s26 }
   0x5   : > { %p98_p0 = scmp.eq.s32.totalorder %s97_s30, 0  ;;  %p107_p1 = scmp.ne.s32.totalorder %s2059_s26, %s2055_s25 }
   0x6   : > { %p108_p2 = scmp.eq.s32.totalorder %s2063_s27, 0  ;;  %p113_p3 = scmp.ne.s32.totalorder %s2055_s25, %s2051_s24 }
   0x7   : > { %s2141_s9 = scalar_select %p98_p0, %s2059_s26, %s100_s8  }
   0x8   : > { %p109_p4 = por %p108_p2, %p107_p1  ;;  %p114_p5 = scmp.eq.s32.totalorder %s2128_s28, 0 }
   0x9   : > { %p1873_p6 = scmp.lt.s32.totalorder %s2063_s27, 4  ;;  %s259_s11 = sand.u32 1, %s2059_s26  }
   0xa   : > { %p2145_p7 = por %p114_p5, %p113_p3  ;;  %s1862_s12 = smul.u32 24, %s259_s11 }
   0xb   : > { %s1863_s13 = smul.u32 24, %s2063_s27  ;;  %p2151_p8 = pnand %p1873_p6, %p109_p4 }
   0xc   : > { %s263_s18 = scalar_lea.vmem [#allocation2], %s1862_s12  ;;  %p1708_p9 = scmp.ge.s32.totalorder %s2063_s27, 1 }
   0xd   : > { %s268_s17 = scalar_lea.hbm %s2554_s3, %s1863_s13  ;;  %s271_s19 = sshll.u32 %s263_s18, 4  ;;  %s272_s19 = int_to_ptr.vmem [resolvable:$true] %s271_s19 }
   0xe   : > { %s269_s20 = sshll.u32 %s268_s17, 4  ;;  %s260_s21 = scalar_lea.sflag [#allocation3], %s259_s11  ;;  %s270_s20 = int_to_ptr.hbm [resolvable:$true] %s269_s20 }
   0xf   : > { %s1999_s22 = sshra.s32 %s270_s20, 4  ;;  %p2003_p11 = pneg %p2151_p8  ;;  %s2000_s22 = int_to_ptr.hbm [resolvable:$true] %s1999_s22 }
  0x10   : > { %s2001_s23 = scalar_lea.hbm %s2000_s22, 24  ;;  %s2006_s8 = scalar_lea.hbm %s2554_s3, 96 }
  0x11   : > { %p2002_p10 = scmp.ne.s32.totalorder %s2000_s22, %s2001_s23  ;;  %p2007_p0 = scmp.lt.s32.totalorder %s2000_s22, %s2554_s3 }
  0x12   : > { %p2008_p1 = scmp.lt.s32.totalorder %s2006_s8, %s2001_s23 }
  0x13   : > { %p2004_p12 = pnand %p2003_p11, %p2002_p10 }
  0x14   : > { %p2009_p2 = por %p2008_p1, %p2007_p0 }
  0x15   : > { %p2005_p13 = pneg %p2004_p12 }
  0x17   : > { %p2010_p3 = pnand %p2009_p2, %p2005_p13 }
  0x19   : > { %2013 = shalt.err (!%p2010_p3)
}
  0x1a   : > { %s2065_s11 = smov 64   ;;  %s2066_s15 = smov 4  }
  0x1b   : > { %1872 = dma.hbm_to_vmem [thread:$0]  (!%p2151_p8), %s270_s20, 384, %s272_s19, %s260_s21, %s2065_s11, %s2065_s11, %s2066_s15  }
  0x1c   : > { %p301_p4 = scmp.lt.s32.totalorder %s2063_s27, 5 }
  0x1e   : > { %p302_p5 = pnand %p1708_p9, %p301_p4 }
  0x1f   : > { %s307_s16 = sand.u32 (!%p302_p5), 1, %s2055_s25  }
  0x20   : > { %305 = sbr.rel (%p302_p5) target bundleno = 1734 (0x6c6), region = 48  ;;  %s308_s18 = scalar_lea.sflag (!%p302_p5), [#allocation3], %s307_s16 }
  0x21   : > { %s1864_s17 = smul.u32 (!%p302_p5), 24, %s307_s16 }
  0x23   : > { %s2173_s22 = scalar_lea.vmem (!%p302_p5), [#allocation2], %s1864_s17 }
  0x25   : > { %2046 = dma.done.wait (%p2145_p7), %s308_s18, 384  }
  0x26   : > { %2048 = vsyncadd (%p2145_p7), %s308_s18, 4294966912  ;;  %p364_p6 = scmp.lt.s32.totalorder %s2128_s28, 3  ;;  %v1853_v0 = vld [vmem:[%s2173_s22] sm:$0xff]  ;;  %v1854_v1 = vld [vmem:[%s2173_s22 + $0x8] sm:$0xff]  ;;  %v2067_v2 = vmov 0   ;;  %vm486_vm0 = vcmask 130048   ;;  %v399_v42 = vlaneseq }
  0x27   : > { %1910 = vset.pattern.permute.xlu0 %v2067_v2  ;;  %1911 = vset.pattern.permute.xlu1 %v2067_v2  ;;  %v1850_v3 = vld [vmem:[%s2553_s2] sm:$0xff]  ;;  %v1851_v7 = vld [vmem:[%s2553_s2 + $0x8] sm:$0xff]  ;;  %v1852_v14 = vld [vmem:[%s2553_s2 + $0x10] sm:$0xff]  ;;  %vm548_vm9 = vcmask 1040384   ;;  %v2068_v55 = vmov 0.0   ;;  %vm535_vm12 = vcmask 408576  }
  0x28   : > { %s2566_s28 = smov (!%p364_p6, %s2128_s28), 3  ;;  %1912 = vset.pattern.permute.xlu2 %v2067_v2  ;;  %506 = vmatpush.bf16.msra.mxu0 %v1853_v0  ;;  %v1855_v8 = vld [vmem:[%s2173_s22 + $0x10] sm:$0xff]  ;;  %v459_v17 = vld [vmem:[%s2553_s2 + $0x18] sm:$0x1]  ;;  %v2254_v46 = vand.u32 127, %v399_v42 }
  0x29   : > { %s1849_s27 = sshll.u32 %s2566_s28, 6  ;;  %s1866_s21 = smul.u32 3, %s2566_s28  ;;  %597 = vmatpush.bf16.msra.mxu2 %v1854_v1  ;;  %v475_v18 = vunpack.c.l.b16 %v459_v17 }
  0x2a   : > { %s2187_s20 = scalar_lea.vmem %s2551_s0, %s1849_s27  ;;  %s1711_s15 = sshll.u32 %s2566_s28, 3 }
  0x2b   : > { %s2200_s8 = scalar_lea.vmem %s2556_s5, %s1866_s21  ;;  %s2205_s11 = scalar_lea.vmem %s2557_s6, %s1866_s21  ;;  %v391_v4 = vld [vmem:[%s2187_s20] sm:$0xff]  ;;  %1738 = vmatmul.msk.bf16.vlgmr.msra.gmra.mxu0 %vm486_vm0, %v1850_v3  ;;  %v392_v5 = vld [vmem:[%s2187_s20 + $0x8] sm:$0xff]  ;;  %v397_v6 = vld [vmem:[%s2187_s20 + $0x30] sm:$0xff]  ;;  %v479_v20 = vpack.c.b16 %v475_v18, %v475_v18 }
  0x2c   : > { %402 = vperm.xlu0 %1910, %v391_v4   ;;  %1752 = vmatmul.msk.bf16.vlgmr.msra.gmra.mxu2 %vm486_vm0, %v1850_v3  ;;  %s372_s14 = scalar_lea.vmem %s2552_s1, %s1711_s15  ;;  %v393_v10 = vld [vmem:[%s2187_s20 + $0x10] sm:$0xff]  ;;  %v394_v12 = vld [vmem:[%s2187_s20 + $0x18] sm:$0xff]  ;;  %v395_v22 = vld [vmem:[%s2187_s20 + $0x20] sm:$0xff]  ;;  %s389_s12 = scalar_lea.vmem %s2558_s7, %s1711_s15 }
  0x2d   : > { %v756_v9 = vld [vmem:[%s372_s14] sm:$0xff]  ;;  %675 = vmatpush.bf16.msrb.mxu0 %v1855_v8  ;;  %408 = vperm.xlu1 %1911, %v393_v10   ;;  %v398_v15 = vld [vmem:[%s2187_s20 + $0x38] sm:$0xff]  ;;  %v396_v23 = vld [vmem:[%s2187_s20 + $0x28] sm:$0xff]  ;;  %s1865_s20 = smul.u32 48, %s2566_s28 }
  0x2e   : > { %vm989_vm1 = vcmp.gt.s32.totalorder %v756_v9, 1  ;;  %vm1280_vm2 = vcmp.gt.s32.totalorder %v756_v9, 4  ;;  %vm1571_vm3 = vcmp.gt.s32.totalorder %v756_v9, 7  ;;  %vm1086_vm4 = vcmp.gt.s32.totalorder %v756_v9, 2  ;;  %414 = vperm.xlu2 %1912, %v395_v22  }
  0x2f   : > { %v990_v11 = vsel %vm989_vm1, 1, %v2067_v2  ;;  %v1281_v13 = vsel %vm1280_vm2, 1, %v2067_v2  ;;  %v1572_v16 = vsel %vm1571_vm3, 1, %v2067_v2  ;;  %v1087_v19 = vsel %vm1086_vm4, 1, %v2067_v2  ;;  %s2260_s30 = scalar_lea.vmem %s2555_s4, %s1865_s20 }
  0x30   : > { %vm1377_vm5 = vcmp.gt.s32.totalorder %v756_v9, 5  ;;  %vm892_vm6 = vcmp.gt.s32.totalorder %v756_v9, 0  ;;  %vm1183_vm7 = vcmp.gt.s32.totalorder %v756_v9, 3  ;;  %vm1474_vm8 = vcmp.gt.s32.totalorder %v756_v9, 6  ;;  %v2265_v53 = vld [vmem:[%s2260_s30 + $0x8] sm:$0xff]  ;;  %v2275_v63 = vld [vmem:[%s2260_s30 + $0x18] sm:$0xff] }
  0x31   : > { %v1378_v21 = vsel %vm1377_vm5, 1, %v2067_v2  ;;  %v893_v24 = vsel %vm892_vm6, 1, %v2067_v2  ;;  %v1184_v25 = vsel %vm1183_vm7, 1, %v2067_v2  ;;  %v1475_v26 = vsel %vm1474_vm8, 1, %v2067_v2  ;;  %v2285_v10 = vld [vmem:[%s2260_s30] sm:$0xff] }
  0x34   : > { %405 = vperm.xlu0 %1910, %v392_v5  }
  0x35   : > { %411 = vperm.xlu1 %1911, %v394_v12   ;;  %v2291_v12 = vld [vmem:[%s2260_s30 + $0x10] sm:$0xff] }
  0x36   : > { %417 = vperm.xlu2 %1912, %v396_v23  }
  0x3b   : > { %1739 = vmatmul.msk.bf16.gmra.mxu0 %vm486_vm0, %v1851_v7 }
  0x3c   : > { %420 = vperm.xlu0 %1910, %v397_v6   ;;  %1753 = vmatmul.msk.bf16.gmra.mxu2 %vm486_vm0, %v1851_v7 }
  0x3d   : > { %423 = vperm.xlu1 %1911, %v398_v15  }
  0x3e   : > { %895 = vperm.xlu2 %1912, %v893_v24  }
  0x44   : > { %992 = vperm.xlu0 %1910, %v990_v11  }
  0x45   : > { %1089 = vperm.xlu1 %1911, %v1087_v19  }
  0x46   : > { %1186 = vperm.xlu2 %1912, %v1184_v25  }
  0x4b   : > { %1740 = vmatmul.msk.bf16.gmra.mxu0 %vm486_vm0, %v1852_v14 }
  0x4c   : > { %1283 = vperm.xlu0 %1910, %v1281_v13   ;;  %1754 = vmatmul.msk.bf16.gmra.mxu2 %vm486_vm0, %v1852_v14 }
  0x4d   : > { %1380 = vperm.xlu1 %1911, %v1378_v21  }
  0x4e   : > { %1477 = vperm.xlu2 %1912, %v1475_v26   ;;  %v2303_v26 = vld [vmem:[%s2260_s30 + $0x28] sm:$0xff] }
  0x4f   : > { %1032 = vmatpush.bf16.msra.mxu0 %v2303_v26 }
  0x54   : > { %1574 = vperm.xlu0 %1910, %v1572_v16  }
  0x5b   : > { %1741 = vmatmul.msk.bf16.gmra.mxu0 %vm486_vm0, %v479_v20 }
  0x5c   : > { %1755 = vmatmul.msk.bf16.gmra.mxu2 %vm486_vm0, %v479_v20 }
  0x6b   : > { %1767 = vmatmul.msk.bf16.vlgmr.msrb.gmra.mxu0 %vm486_vm0, %v1850_v3 }
  0x7b   : > { %1768 = vmatmul.msk.bf16.gmra.mxu0 %vm486_vm0, %v1851_v7 }
  0x88   : > { %v415_v6 = vpop.permute.xlu2 %414 }
  0x89   : > { %vm429_vm15 = vcmp.eq.s32.totalorder %v2254_v46, %v415_v6 }
  0x8a   : > { %v1718_v13 = vsel %vm429_vm15, 1.0, %v2068_v55 }
  0x8b   : > { %1769 = vmatmul.msk.bf16.gmra.mxu0 %vm486_vm0, %v1852_v14 }
  0x90   : > { %v418_v11 = vpop.permute.xlu2 %417 }
  0x9b   : > { %1770 = vmatmul.msk.bf16.gmra.mxu0 %vm486_vm0, %v479_v20  ;;  %vm430_vm0 = vcmp.eq.s32.totalorder %v2254_v46, %v418_v11  ;;  %v2369_v11 = vld [vmem:[%s2205_s11 + $0x1] ss:$0 sm:$0xff] }
  0x9c   : > { %v1719_v14 = vsel %vm430_vm0, 1.0, %v2068_v55 }
  0x9d   : > { %v451_v16 = vpack.c.bf16 %v1719_v14, %v1718_v13 }
  0x9e   : > { %v403_v39 = vpop.permute.xlu0 %402 }
  0x9f   : > { %vm425_vm10 = vcmp.eq.s32.totalorder %v2254_v46, %v403_v39  ;;  %v409_v60 = vpop.permute.xlu1 %408  ;;  %v1914_v39 = vld [vmem:[%s2200_s8 + $0x1] ss:$0 sm:$0xff] }
  0xa0   : > { %v1714_v56 = vsel %vm425_vm10, 1.0, %v2068_v55  ;;  %vm427_vm13 = vcmp.eq.s32.totalorder %v2254_v46, %v409_v60 }
  0xa1   : > { %v1716_v4 = vsel %vm427_vm13, 1.0, %v2068_v55 }
  0xa6   : > { %v406_v51 = vpop.permute.xlu0 %405 }
  0xa7   : > { %vm426_vm11 = vcmp.eq.s32.totalorder %v2254_v46, %v406_v51  ;;  %v412_v3 = vpop.permute.xlu1 %411 }
  0xa8   : > { %v508_v27 = vpop.f32.mrf.mxu0  ;;  %v1715_v57 = vsel %vm426_vm11, 1.0, %v2068_v55  ;;  %vm428_vm14 = vcmp.eq.s32.totalorder %v2254_v46, %v412_v3 }
  0xa9   : > { %v2269_v62 = vpack.c.bf16 %v1715_v57, %v1714_v56  ;;  %v1717_v5 = vsel %vm428_vm14, 1.0, %v2068_v55 }
  0xaa   : > { %v450_v8 = vpack.c.bf16 %v1717_v5, %v1716_v4 }
  0xae   : > { %v421_v19 = vpop.permute.xlu0 %420 }
  0xaf   : > { %v599_v28 = vpop.f32.mrf.mxu2  ;;  %v424_v17 = vpop.permute.xlu1 %423  ;;  %vm431_vm1 = vcmp.eq.s32.totalorder %v2254_v46, %v421_v19 }
  0xb0   : > { %v510_v29 = vpop.f32.mrf.mxu0  ;;  %vm432_vm2 = vcmp.eq.s32.totalorder %v2254_v46, %v424_v17  ;;  %v1720_v20 = vsel %vm431_vm1, 1.0, %v2068_v55 }
  0xb1   : > { %v527_v54 = vpack.c.bf16 %v510_v29, %v508_v27  ;;  %v1721_v21 = vsel %vm432_vm2, 1.0, %v2068_v55 }
  0xb2   : > { %v452_v23 = vpack.c.bf16 %v1721_v21, %v1720_v20 }
  0xb7   : > { %v601_v30 = vpop.f32.mrf.mxu2 }
  0xb8   : > { %v513_v31 = vpop.f32.mrf.mxu0  ;;  %v618_v0 = vpack.c.bf16 %v601_v30, %v599_v28  ;;  %v2307_v28 = vld [vmem:[%s2260_s30 + $0x20] sm:$0xff] }
  0xb9   : > { %1033 = vmatpush.bf16.msra.mxu0 %v2307_v28 }
  0xbd   : > { %1200 = vmatpush.bf16.msrb.mxu0 %v2265_v53 }
  0xbf   : > { %v604_v32 = vpop.f32.mrf.mxu2 }
  0xc0   : > { %v515_v33 = vpop.f32.mrf.mxu0 }
  0xc1   : > { %v528_v50 = vpack.c.bf16 %v515_v33, %v513_v31  ;;  %1201 = vmatpush.bf16.msrb.mxu0 %v2285_v10  ;;  %v1913_v33 = vld [vmem:[%s2200_s8] ss:$0 sm:$0xff] }
  0xc7   : > { %v606_v34 = vpop.f32.mrf.mxu2 }
  0xc8   : > { %v518_v35 = vpop.f32.mrf.mxu0  ;;  %v619_v59 = vpack.c.bf16 %v606_v34, %v604_v32 }
  0xcf   : > { %v609_v36 = vpop.f32.mrf.mxu2 }
  0xd0   : > { %v520_v37 = vpop.f32.mrf.mxu0 }
  0xd1   : > { %v529_v44 = vpack.c.bf16 %v520_v37, %v518_v35 }
  0xd7   : > { %v611_v38 = vpop.f32.mrf.mxu2 }
  0xd8   : > { %v523_v40 = vpop.f32.mrf.mxu0  ;;  %v620_v52 = vpack.c.bf16 %v611_v38, %v609_v36 }
  0xd9   : > { %v530_v41 = vpack.c.bf16 %v523_v40, %v523_v40 }
  0xdb   : > { %v550_v43 = vsel %vm548_vm9, %v530_v41, 0 }
  0xdc   : > { %556 = vmatpush.bf16.msra.mxu1 %v550_v43 }
  0xdf   : > { %v614_v45 = vpop.f32.mrf.mxu2 }
  0xe0   : > { %v621_v47 = vpack.c.bf16 %v614_v45, %v614_v45  ;;  %v525_v48 = vpop.f32.mrf.mxu0  ;;  %557 = vmatpush.bf16.msra.mxu1 %v529_v44 }
  0xe2   : > { %v628_v49 = vsel %vm548_vm9, %v621_v47, 0 }
  0xe3   : > { %634 = vmatpush.bf16.msra.mxu3 %v628_v49 }
  0xe4   : > { %558 = vmatpush.bf16.msra.mxu1 %v528_v50 }
  0xe7   : > { %635 = vmatpush.bf16.msra.mxu3 %v620_v52  ;;  %v616_v58 = vpop.f32.mrf.mxu2 }
  0xe8   : > { %559 = vmatpush.bf16.msra.mxu1 %v527_v54  ;;  %v2267_v61 = vpop.f32.mrf.mxu0 }
  0xeb   : > { %636 = vmatpush.bf16.msra.mxu3 %v619_v59  ;;  %1742 = vmatmul.msk.bf16.vlgmr.msra.gmra.mxu1 %vm535_vm12, %v2269_v62 }
  0xec   : > { %782 = vmatpush.bf16.msrb.mxu1 %v2265_v53 }
  0xef   : > { %637 = vmatpush.bf16.msra.mxu3 %v618_v0 }
  0xf0   : > { %v679_v1 = vpop.f32.mrf.mxu0  ;;  %783 = vmatpush.bf16.msrb.mxu1 %v2285_v10 }
  0xf1   : > { %v696_v31 = vpack.c.bf16 %v679_v1, %v2267_v61 }
  0xf2   : > { %1757 = vmatmul.msk.bf16.vlgmr.msra.gmra.mxu3 %vm535_vm12, %v2269_v62 }
  0xf3   : > { %810 = vmatpush.bf16.msrb.mxu3 %v2275_v63 }
  0xf4   : > { %838 = vmatpush.bf16.msra.mxu1 %v2303_v26 }
  0xf7   : > { %811 = vmatpush.bf16.msrb.mxu3 %v2291_v12 }
  0xf8   : > { %v682_v7 = vpop.f32.mrf.mxu0  ;;  %839 = vmatpush.bf16.msra.mxu1 %v2307_v28 }
  0xfb   : > { %1743 = vmatmul.msk.bf16.gmra.mxu1 %vm535_vm12, %v450_v8  ;;  %909 = vmatpush.bf16.msra.mxu3 %v2265_v53 }
  0xff   : > { %910 = vmatpush.bf16.msra.mxu3 %v2285_v10 }
 0x100   : > { %v684_v9 = vpop.f32.mrf.mxu0 }
 0x101   : > { %v697_v30 = vpack.c.bf16 %v684_v9, %v682_v7 }
 0x102   : > { %1758 = vmatmul.msk.bf16.gmra.mxu3 %vm535_vm12, %v450_v8 }
 0x108   : > { %v687_v15 = vpop.f32.mrf.mxu0 }
 0x10b   : > { %1744 = vmatmul.msk.bf16.gmra.mxu1 %vm535_vm12, %v451_v16 }
 0x110   : > { %v689_v18 = vpop.f32.mrf.mxu0 }
 0x111   : > { %v698_v27 = vpack.c.bf16 %v689_v18, %v687_v15 }
 0x112   : > { %1759 = vmatmul.msk.bf16.gmra.mxu3 %vm535_vm12, %v451_v16 }
 0x118   : > { %v692_v22 = vpop.f32.mrf.mxu0 }
 0x119   : > { %v699_v24 = vpack.c.bf16 %v692_v22, %v692_v22 }
 0x11b   : > { %1745 = vmatmul.msk.bf16.gmra.mxu1 %vm535_vm12, %v452_v23  ;;  %v706_v25 = vsel %vm548_vm9, %v699_v24, 0 }
 0x11c   : > { %712 = vmatpush.bf16.msrb.mxu2 %v706_v25 }
 0x120   : > { %v694_v29 = vpop.f32.mrf.mxu0  ;;  %713 = vmatpush.bf16.msrb.mxu2 %v698_v27 }
 0x122   : > { %1760 = vmatmul.msk.bf16.gmra.mxu3 %vm535_vm12, %v452_v23 }
 0x124   : > { %714 = vmatpush.bf16.msrb.mxu2 %v697_v30  ;;  %v2377_v30 = vld [vmem:[%s2205_s11 + $0x2] ss:$0 sm:$0xff] }
 0x128   : > { %715 = vmatpush.bf16.msrb.mxu2 %v696_v31 }
 0x12b   : > { %1772 = vmatmul.msk.bf16.vlgmr.msrb.gmra.mxu2 %vm535_vm12, %v2269_v62  ;;  %784 = vmatmul.bf16.vlgmr.msrb.gmra.mxu1 %v2067_v2  ;;  %v2363_v62 = vld [vmem:[%s2205_s11] ss:$0 sm:$0xff] }
 0x12c   : > { %1103 = vmatpush.bf16.msra.mxu2 %v2265_v53  ;;  %922 = vmatpush.bf16.msrb.mxu1 %v2275_v63 }
 0x130   : > { %1104 = vmatpush.bf16.msra.mxu2 %v2285_v10  ;;  %923 = vmatpush.bf16.msrb.mxu1 %v2291_v12 }
 0x132   : > { %812 = vmatmul.bf16.vlgmr.msrb.gmra.mxu3 %v2067_v2 }
 0x133   : > { %935 = vmatpush.bf16.msrb.mxu3 %v2303_v26 }
 0x134   : > { %1213 = vmatpush.bf16.msrb.mxu2 %v2275_v63 }
 0x137   : > { %936 = vmatpush.bf16.msrb.mxu3 %v2307_v28 }
 0x138   : > { %1214 = vmatpush.bf16.msrb.mxu2 %v2291_v12 }
 0x13b   : > { %1773 = vmatmul.msk.bf16.gmra.mxu2 %vm535_vm12, %v450_v8  ;;  %840 = vmatmul.bf16.vlgmr.msra.gmra.mxu1 %v2067_v2 }
 0x13c   : > { %1006 = vmatpush.bf16.msra.mxu1 %v2265_v53 }
 0x140   : > { %1007 = vmatpush.bf16.msra.mxu1 %v2285_v10 }
 0x14b   : > { %1774 = vmatmul.msk.bf16.gmra.mxu2 %vm535_vm12, %v451_v16 }
 0x15b   : > { %1775 = vmatmul.msk.bf16.gmra.mxu2 %vm535_vm12, %v452_v23  ;;  %vm772_vm12 = vcmask 261120  }
 0x168   : > { %v561_v32 = vpop.f32.mrf.mxu1 }
 0x169   : > { %v562_v1 = vadd.f32 %v1913_v33, %v561_v32 }
 0x170   : > { %v563_v34 = vpop.f32.mrf.mxu1 }
 0x171   : > { %v2335_v35 = vadd.f32 %v1913_v33, %v563_v34 }
 0x175   : > { %v639_v36 = vpop.f32.mrf.mxu3 }
 0x176   : > { %v640_v15 = vadd.f32 %v1914_v39, %v639_v36 }
 0x178   : > { %v566_v37 = vpop.f32.mrf.mxu1 }
 0x179   : > { %v2337_v38 = vadd.f32 %v1913_v33, %v566_v37  ;;  %v2380_v37 = vld [vmem:[%s2200_s8 + $0x2] ss:$0 sm:$0xff] }
 0x17d   : > { %v641_v40 = vpop.f32.mrf.mxu3 }
 0x17e   : > { %v2340_v2 = vadd.f32 %v1914_v39, %v641_v40 }
 0x180   : > { %v568_v41 = vpop.f32.mrf.mxu1 }
 0x181   : > { %v2342_v42 = vadd.f32 %v1913_v33, %v568_v41 }
 0x185   : > { %v644_v43 = vpop.f32.mrf.mxu3 }
 0x186   : > { %v2344_v44 = vadd.f32 %v1914_v39, %v644_v43 }
 0x188   : > { %v571_v45 = vpop.f32.mrf.mxu1 }
 0x189   : > { %v2346_v46 = vadd.f32 %v1913_v33, %v571_v45 }
 0x18d   : > { %v646_v47 = vpop.f32.mrf.mxu3 }
 0x18e   : > { %v2348_v48 = vadd.f32 %v1914_v39, %v646_v47 }
 0x190   : > { %v573_v49 = vpop.f32.mrf.mxu1 }
 0x191   : > { %v2350_v50 = vadd.f32 %v1913_v33, %v573_v49 }
 0x195   : > { %v649_v51 = vpop.f32.mrf.mxu3 }
 0x196   : > { %v2352_v52 = vadd.f32 %v1914_v39, %v649_v51 }
 0x198   : > { %v576_v54 = vpop.f32.mrf.mxu1 }
 0x199   : > { %v2354_v55 = vadd.f32 %v1913_v33, %v576_v54 }
 0x19d   : > { %v651_v56 = vpop.f32.mrf.mxu3 }
 0x19e   : > { %v2356_v57 = vadd.f32 %v1914_v39, %v651_v56 }
 0x1a0   : > { %v578_v58 = vpop.f32.mrf.mxu1 }
 0x1a1   : > { %v2358_v59 = vadd.f32 %v1913_v33, %v578_v58 }
 0x1a5   : > { %v654_v60 = vpop.f32.mrf.mxu3 }
 0x1a6   : > { %v2360_v61 = vadd.f32 %v1914_v39, %v654_v60 }
 0x1a8   : > { %v785_v0 = vpop.f32.mrf.mxu1 }
 0x1a9   : > { %v786_v3 = vadd.f32 %v2363_v62, %v785_v0 }
 0x1ab   : > { %v845_v4 = vadd.f32 %v786_v3, %v562_v1 }
 0x1ad   : > { %v656_v5 = vpop.f32.mrf.mxu3  ;;  %v1810_v6 = vmul.f32 -1.442695, %v845_v4 }
 0x1ae   : > { %v2366_v7 = vadd.f32 %v1914_v39, %v656_v5  ;;  %v717_v8 = vpop.f32.mrf.mxu2 }
 0x1af   : > { %1919 = vpow2.f32 %v1810_v6  ;;  %v718_v56 = vadd.f32 %v2380_v37, %v717_v8 }
 0x1b0   : > { %v787_v9 = vpop.f32.mrf.mxu1 }
 0x1b5   : > { %v813_v13 = vpop.f32.mrf.mxu3  ;;  %v1920_v14 = vpop.eup %1919 }
 0x1b6   : > { %v814_v16 = vadd.f32 %v2369_v11, %v813_v13  ;;  %v849_v17 = vadd.f32 1.0, %v1920_v14  ;;  %v2372_v18 = vpop.f32.mrf.mxu2 }
 0x1b8   : > { %v865_v19 = vadd.f32 %v814_v16, %v640_v15  ;;  %1921 = vrcp.f32 %v849_v17  ;;  %v841_v20 = vpop.f32.mrf.mxu1  ;;  %v861_v33 = vand.u32 2147483648, %v849_v17  ;;  %v859_v36 = vand.u32 2147483647, %v849_v17 }
 0x1b9   : > { %v842_v39 = vadd.f32 %v2377_v30, %v841_v20  ;;  %vm855_vm4 = vweird.f32 %v849_v17 }
 0x1ba   : > { %v1811_v21 = vmul.f32 -1.442695, %v865_v19  ;;  %v862_v43 = vor.u32 1.1754944e-38, %v861_v33  ;;  %vm860_vm6 = vcmp.eq.f32.partialorder %v859_v36, 8.507059e+37 }
 0x1bc   : > { %1923 = vpow2.f32 %v1811_v21 }
 0x1bd   : > { %v815_v22 = vpop.f32.mrf.mxu3 }
 0x1be   : > { %v1922_v23 = vpop.eup %1921  ;;  %v2374_v24 = vpop.f32.mrf.mxu2 }
 0x1bf   : > { %v851_v25 = vmul.f32 %v1922_v23, %v849_v17  ;;  %vm856_vm3 = vweird.f32 %v1922_v23  ;;  %v896_v22 = vpop.permute.xlu2 %895 }
 0x1c0   : > { %v843_v27 = vpop.f32.mrf.mxu1  ;;  %vm857_vm5 = vmor %vm855_vm4, %vm856_vm3  ;;  %vm897_vm11 = vcmp.eq.s32.totalorder %v896_v22, 1 }
 0x1c1   : > { %v852_v31 = vsub.f32 1.0, %v851_v25 }
 0x1c2   : > { %v1924_v29 = vpop.eup %1923 }
 0x1c3   : > { %v869_v32 = vadd.f32 1.0, %v1924_v29  ;;  %v853_v34 = vmul.f32 %v1922_v23, %v852_v31 }
 0x1c5   : > { %1925 = vrcp.f32 %v869_v32  ;;  %v854_v40 = vadd.f32 %v1922_v23, %v853_v34  ;;  %v881_v1 = vand.u32 2147483648, %v869_v32  ;;  %v879_v5 = vand.u32 2147483647, %v869_v32 }
 0x1c6   : > { %v724_v41 = vpop.f32.mrf.mxu2  ;;  %vm875_vm8 = vweird.f32 %v869_v32 }
 0x1c7   : > { %v2384_v45 = vadd.f32 %v2380_v37, %v724_v41  ;;  %v858_v47 = vsel %vm857_vm5, %v1922_v23, %v854_v40  ;;  %v882_v13 = vor.u32 1.1754944e-38, %v881_v1  ;;  %vm880_vm10 = vcmp.eq.f32.partialorder %v879_v5, 8.507059e+37 }
 0x1c8   : > { %v863_v49 = vsel %vm860_vm6, %v862_v43, %v858_v47 }
 0x1c9   : > { %v885_v51 = vmul.f32 %v863_v49, %v842_v39 }
 0x1cb   : > { %v1926_v54 = vpop.eup %1925  ;;  %v886_v60 = vadd.f32 %v885_v51, %v718_v56 }
 0x1cc   : > { %v871_v58 = vmul.f32 %v1926_v54, %v869_v32  ;;  %vm876_vm7 = vweird.f32 %v1926_v54 }
 0x1cd   : > { %1927 = vtanh.f32 %v886_v60  ;;  %vm877_vm9 = vmor %vm875_vm8, %vm876_vm7 }
 0x1ce   : > { %v872_v0 = vsub.f32 1.0, %v871_v58  ;;  %v727_v3 = vpop.f32.mrf.mxu2 }
 0x1cf   : > { %v2388_v6 = vadd.f32 %v2380_v37, %v727_v3 }
 0x1d0   : > { %v873_v4 = vmul.f32 %v1926_v54, %v872_v0 }
 0x1d2   : > { %v874_v9 = vadd.f32 %v1926_v54, %v873_v4 }
 0x1d3   : > { %v1928_v16 = vpop.eup %1927 }
 0x1d4   : > { %v878_v14 = vsel %vm877_vm9, %v1926_v54, %v874_v9 }
 0x1d5   : > { %v883_v15 = vsel %vm880_vm10, %v882_v13, %v878_v14 }
 0x1d6   : > { %v888_v8 = vsub.f32 1.0, %v883_v15  ;;  %v729_v17 = vpop.f32.mrf.mxu2  ;;  %v890_v20 = vmul.f32 0.0, %v883_v15 }
 0x1d7   : > { %v2391_v21 = vadd.f32 %v2380_v37, %v729_v17 }
 0x1d8   : > { %v889_v19 = vmul.f32 %v1928_v16, %v888_v8 }
 0x1da   : > { %v891_v23 = vadd.f32 %v890_v20, %v889_v19 }
 0x1dc   : > { %v2393_v25 = vsel %vm897_vm11, %v891_v23, 0.0  ;;  %v720_v23 = vadd.f32 %v2380_v37, %v2372_v18 }
 0x1dd   : > { %v899_v27 = vpack.c.bf16 %v2393_v25, %v2393_v25 }
 0x1de   : > { %v732_v29 = vpop.f32.mrf.mxu2 }
 0x1df   : > { %1812 = vmatmul.msk.bf16.vlgmr.msra.gmra.mxu3 %vm772_vm12, %v899_v27  ;;  %1813 = vmatmul.msk.bf16.vlgmr.msrb.gmra.mxu1 %vm772_vm12, %v899_v27  ;;  %v2400_v31 = vadd.f32 %v2380_v37, %v732_v29 }
 0x1e0   : > { %1019 = vmatpush.bf16.msra.mxu3 %v2275_v63  ;;  %1116 = vmatpush.bf16.msrb.mxu1 %v2275_v63 }
 0x1e4   : > { %1020 = vmatpush.bf16.msra.mxu3 %v2291_v12  ;;  %1117 = vmatpush.bf16.msrb.mxu1 %v2291_v12 }
 0x1ef   : > { %1814 = vmatmul.msk.bf16.vlgmr.msrb.gmra.mxu3 %vm772_vm12, %v899_v27 }
 0x1f0   : > { %1129 = vmatpush.bf16.msrb.mxu3 %v2303_v26 }
 0x1f4   : > { %1130 = vmatpush.bf16.msrb.mxu3 %v2307_v28 }
 0x25c   : > { %v925_v32 = vpop.f32.mrf.mxu1 }
 0x25d   : > { %v926_v33 = vadd.f32 %v2369_v11, %v925_v32 }
 0x25f   : > { %v962_v34 = vadd.f32 %v926_v33, %v2340_v2 }
 0x261   : > { %v1816_v36 = vmul.f32 -1.442695, %v962_v34 }
 0x262   : > { %v912_v39 = vpop.f32.mrf.mxu3 }
 0x263   : > { %1929 = vpow2.f32 %v1816_v36  ;;  %v913_v40 = vadd.f32 %v2363_v62, %v912_v39 }
 0x264   : > { %v927_v41 = vpop.f32.mrf.mxu1 }
 0x265   : > { %v942_v43 = vadd.f32 %v913_v40, %v2335_v35 }
 0x267   : > { %v1815_v47 = vmul.f32 -1.442695, %v942_v43 }
 0x269   : > { %v1930_v49 = vpop.eup %1929  ;;  %1931 = vpow2.f32 %v1815_v47 }
 0x26a   : > { %v966_v51 = vadd.f32 1.0, %v1930_v49  ;;  %v914_v54 = vpop.f32.mrf.mxu3  ;;  %v993_v49 = vpop.permute.xlu0 %992 }
 0x26b   : > { %vm994_vm5 = vcmp.eq.s32.totalorder %v993_v49, 1 }
 0x26c   : > { %1933 = vrcp.f32 %v966_v51  ;;  %v978_v27 = vand.u32 2147483648, %v966_v51  ;;  %vm972_vm2 = vweird.f32 %v966_v51  ;;  %v976_v32 = vand.u32 2147483647, %v966_v51 }
 0x26e   : > { %v979_v36 = vor.u32 1.1754944e-38, %v978_v27  ;;  %vm977_vm4 = vcmp.eq.f32.partialorder %v976_v32, 8.507059e+37 }
 0x26f   : > { %v1932_v56 = vpop.eup %1931 }
 0x270   : > { %v946_v58 = vadd.f32 1.0, %v1932_v56 }
 0x272   : > { %1935 = vrcp.f32 %v946_v58  ;;  %v938_v60 = vpop.f32.mrf.mxu3  ;;  %v1934_v0 = vpop.eup %1933  ;;  %v958_v13 = vand.u32 2147483648, %v946_v58  ;;  %v956_v35 = vand.u32 2147483647, %v946_v58  ;;  %vm952_vm14 = vweird.f32 %v946_v58 }
 0x273   : > { %v968_v2 = vmul.f32 %v1934_v0, %v966_v51  ;;  %v939_v17 = vadd.f32 %v2377_v30, %v938_v60  ;;  %vm973_vm1 = vweird.f32 %v1934_v0 }
 0x274   : > { %v959_v16 = vor.u32 1.1754944e-38, %v958_v13  ;;  %vm957_vm0 = vcmp.eq.f32.partialorder %v956_v35, 8.507059e+37  ;;  %vm974_vm3 = vmor %vm972_vm2, %vm973_vm1 }
 0x275   : > { %v969_v4 = vsub.f32 1.0, %v968_v2 }
 0x277   : > { %v970_v15 = vmul.f32 %v1934_v0, %v969_v4 }
 0x278   : > { %v1936_v1 = vpop.eup %1935 }
 0x279   : > { %v948_v3 = vmul.f32 %v1936_v1, %v946_v58  ;;  %vm953_vm13 = vweird.f32 %v1936_v1  ;;  %v971_v22 = vadd.f32 %v1934_v0, %v970_v15 }
 0x27a   : > { %v940_v5 = vpop.f32.mrf.mxu3  ;;  %vm954_vm15 = vmor %vm952_vm14, %vm953_vm13 }
 0x27b   : > { %v949_v9 = vsub.f32 1.0, %v948_v3  ;;  %v975_v34 = vsel %vm974_vm3, %v1934_v0, %v971_v22 }
 0x27c   : > { %v980_v39 = vsel %vm977_vm4, %v979_v36, %v975_v34  ;;  %v723_v36 = vadd.f32 %v2380_v37, %v2374_v24 }
 0x27d   : > { %v950_v14 = vmul.f32 %v1936_v1, %v949_v9  ;;  %v985_v40 = vsub.f32 1.0, %v980_v39  ;;  %v987_v47 = vmul.f32 %v980_v39, %v2393_v25 }
 0x27f   : > { %v951_v8 = vadd.f32 %v1936_v1, %v950_v14 }
 0x281   : > { %v955_v19 = vsel %vm954_vm15, %v1936_v1, %v951_v8 }
 0x282   : > { %v960_v20 = vsel %vm957_vm0, %v959_v16, %v955_v19 }
 0x283   : > { %v982_v29 = vmul.f32 %v960_v20, %v939_v17 }
 0x285   : > { %v983_v33 = vadd.f32 %v982_v29, %v720_v23 }
 0x287   : > { %1937 = vtanh.f32 %v983_v33 }
 0x28d   : > { %v1938_v41 = vpop.eup %1937 }
 0x28e   : > { %v986_v43 = vmul.f32 %v1938_v41, %v985_v40 }
 0x290   : > { %v988_v54 = vadd.f32 %v987_v47, %v986_v43 }
 0x292   : > { %v2418_v18 = vsel %vm994_vm5, %v988_v54, %v2393_v25 }
 0x293   : > { %v996_v51 = vpack.c.bf16 %v2418_v18, %v2418_v18 }
 0x295   : > { %1817 = vmatmul.msk.bf16.vlgmr.msra.gmra.mxu1 %vm772_vm12, %v996_v51  ;;  %1818 = vmatmul.msk.bf16.vlgmr.msra.gmra.mxu3 %vm772_vm12, %v996_v51 }
 0x296   : > { %1819 = vmatmul.msk.bf16.vlgmr.msra.gmra.mxu0 %vm772_vm12, %v996_v51  ;;  %1226 = vmatpush.bf16.msra.mxu1 %v2303_v26 }
 0x297   : > { %1297 = vmatpush.bf16.msra.mxu3 %v2265_v53  ;;  %1310 = vmatpush.bf16.msra.mxu0 %v2275_v63 }
 0x29a   : > { %1227 = vmatpush.bf16.msra.mxu1 %v2307_v28 }
 0x29b   : > { %1298 = vmatpush.bf16.msra.mxu3 %v2285_v10  ;;  %1311 = vmatpush.bf16.msra.mxu0 %v2291_v12 }
 0x312   : > { %v1009_v25 = vpop.f32.mrf.mxu1 }
 0x313   : > { %v1010_v56 = vadd.f32 %v2363_v62, %v1009_v25  ;;  %v1035_v58 = vpop.f32.mrf.mxu0 }
 0x314   : > { %v1036_v32 = vadd.f32 %v2377_v30, %v1035_v58 }
 0x315   : > { %v1039_v60 = vadd.f32 %v1010_v56, %v2337_v38 }
 0x317   : > { %v1820_v0 = vmul.f32 -1.442695, %v1039_v60 }
 0x318   : > { %v1022_v2 = vpop.f32.mrf.mxu3 }
 0x319   : > { %1939 = vpow2.f32 %v1820_v0  ;;  %v1023_v1 = vadd.f32 %v2369_v11, %v1022_v2  ;;  %v1090_v2 = vpop.permute.xlu1 %1089 }
 0x31a   : > { %v1011_v3 = vpop.f32.mrf.mxu1  ;;  %vm1091_vm15 = vcmp.eq.s32.totalorder %v1090_v2, 1 }
 0x31b   : > { %v1059_v4 = vadd.f32 %v1023_v1, %v2344_v44  ;;  %v1037_v5 = vpop.f32.mrf.mxu0 }
 0x31d   : > { %v1821_v9 = vmul.f32 -1.442695, %v1059_v4 }
 0x31f   : > { %v1940_v13 = vpop.eup %1939  ;;  %1941 = vpow2.f32 %v1821_v9 }
 0x320   : > { %v1043_v14 = vadd.f32 1.0, %v1940_v13  ;;  %v1024_v35 = vpop.f32.mrf.mxu3 }
 0x322   : > { %1943 = vrcp.f32 %v1043_v14  ;;  %v1055_v19 = vand.u32 2147483648, %v1043_v14  ;;  %v1053_v22 = vand.u32 2147483647, %v1043_v14  ;;  %vm1049_vm7 = vweird.f32 %v1043_v14 }
 0x324   : > { %v1056_v29 = vor.u32 1.1754944e-38, %v1055_v19  ;;  %vm1054_vm9 = vcmp.eq.f32.partialorder %v1053_v22, 8.507059e+37 }
 0x325   : > { %v1942_v15 = vpop.eup %1941 }
 0x326   : > { %v1063_v8 = vadd.f32 1.0, %v1942_v15 }
 0x328   : > { %v1944_v16 = vpop.eup %1943  ;;  %1945 = vrcp.f32 %v1063_v8  ;;  %v1075_v43 = vand.u32 2147483648, %v1063_v8  ;;  %v1073_v47 = vand.u32 2147483647, %v1063_v8  ;;  %vm1069_vm11 = vweird.f32 %v1063_v8 }
 0x329   : > { %v1045_v38 = vmul.f32 %v1944_v16, %v1043_v14  ;;  %vm1050_vm6 = vweird.f32 %v1944_v16 }
 0x32a   : > { %vm1051_vm8 = vmor %vm1049_vm7, %vm1050_vm6  ;;  %v1076_v25 = vor.u32 1.1754944e-38, %v1075_v43  ;;  %vm1074_vm14 = vcmp.eq.f32.partialorder %v1073_v47, 8.507059e+37 }
 0x32b   : > { %v1046_v17 = vsub.f32 1.0, %v1045_v38 }
 0x32d   : > { %v1047_v20 = vmul.f32 %v1944_v16, %v1046_v17 }
 0x32e   : > { %v1946_v23 = vpop.eup %1945 }
 0x32f   : > { %v1048_v27 = vadd.f32 %v1944_v16, %v1047_v20  ;;  %v1065_v44 = vmul.f32 %v1946_v23, %v1063_v8  ;;  %vm1070_vm10 = vweird.f32 %v1946_v23 }
 0x330   : > { %vm1071_vm13 = vmor %vm1069_vm11, %vm1070_vm10 }
 0x331   : > { %v1052_v33 = vsel %vm1051_vm8, %v1944_v16, %v1048_v27  ;;  %v1066_v34 = vsub.f32 1.0, %v1065_v44 }
 0x332   : > { %v1057_v39 = vsel %vm1054_vm9, %v1056_v29, %v1052_v33 }
 0x333   : > { %v1079_v40 = vmul.f32 %v1057_v39, %v1036_v32  ;;  %v1067_v41 = vmul.f32 %v1946_v23, %v1066_v34 }
 0x335   : > { %v1080_v49 = vadd.f32 %v1079_v40, %v723_v36  ;;  %v1068_v54 = vadd.f32 %v1946_v23, %v1067_v41 }
 0x337   : > { %1947 = vtanh.f32 %v1080_v49  ;;  %v1072_v51 = vsel %vm1071_vm13, %v1946_v23, %v1068_v54 }
 0x338   : > { %v1077_v56 = vsel %vm1074_vm14, %v1076_v25, %v1072_v51 }
 0x339   : > { %v1082_v58 = vsub.f32 1.0, %v1077_v56  ;;  %v1084_v24 = vmul.f32 %v1077_v56, %v2418_v18 }
 0x33d   : > { %v1948_v60 = vpop.eup %1947 }
 0x33e   : > { %v1083_v0 = vmul.f32 %v1948_v60, %v1082_v58 }
 0x340   : > { %v1085_v1 = vadd.f32 %v1084_v24, %v1083_v0 }
 0x342   : > { %v2440_v3 = vsel %vm1091_vm15, %v1085_v1, %v2418_v18  ;;  %v2453_v18 = vpop.f32.mrf.mxu2 }
 0x343   : > { %v1093_v4 = vpack.c.bf16 %v2440_v3, %v2440_v3 }
 0x345   : > { %1822 = vmatmul.msk.bf16.vlgmr.msra.gmra.mxu2 %vm772_vm12, %v1093_v4  ;;  %1823 = vmatmul.msk.bf16.vlgmr.msrb.gmra.mxu1 %vm772_vm12, %v1093_v4 }
 0x346   : > { %1824 = vmatmul.msk.bf16.vlgmr.msrb.gmra.mxu3 %vm772_vm12, %v1093_v4  ;;  %1323 = vmatpush.bf16.msra.mxu2 %v2303_v26 }
 0x347   : > { %1394 = vmatpush.bf16.msrb.mxu1 %v2265_v53  ;;  %1407 = vmatpush.bf16.msrb.mxu3 %v2275_v63 }
 0x34a   : > { %1324 = vmatpush.bf16.msra.mxu2 %v2307_v28 }
 0x34b   : > { %1395 = vmatpush.bf16.msrb.mxu1 %v2285_v10  ;;  %1408 = vmatpush.bf16.msrb.mxu3 %v2291_v12 }
 0x3c2   : > { %v1119_v5 = vpop.f32.mrf.mxu1 }
 0x3c3   : > { %v1120_v9 = vadd.f32 %v2369_v11, %v1119_v5 }
 0x3c5   : > { %v1156_v13 = vadd.f32 %v1120_v9, %v2348_v48 }
 0x3c7   : > { %v1826_v14 = vmul.f32 -1.442695, %v1156_v13 }
 0x3c8   : > { %v1106_v35 = vpop.f32.mrf.mxu2 }
 0x3c9   : > { %1949 = vpow2.f32 %v1826_v14  ;;  %v1107_v15 = vadd.f32 %v2363_v62, %v1106_v35  ;;  %v1132_v8 = vpop.f32.mrf.mxu3  ;;  %v1187_v14 = vpop.permute.xlu2 %1186 }
 0x3ca   : > { %v1121_v16 = vpop.f32.mrf.mxu1  ;;  %v1133_v49 = vadd.f32 %v2377_v30, %v1132_v8  ;;  %vm1188_vm8 = vcmp.eq.s32.totalorder %v1187_v14, 1 }
 0x3cb   : > { %v1136_v38 = vadd.f32 %v1107_v15, %v2342_v42 }
 0x3cd   : > { %v1825_v17 = vmul.f32 -1.442695, %v1136_v38 }
 0x3cf   : > { %v1950_v19 = vpop.eup %1949  ;;  %1951 = vpow2.f32 %v1825_v17 }
 0x3d0   : > { %v1160_v20 = vadd.f32 1.0, %v1950_v19  ;;  %v1108_v22 = vpop.f32.mrf.mxu2 }
 0x3d1   : > { %v1134_v23 = vpop.f32.mrf.mxu3 }
 0x3d2   : > { %1953 = vrcp.f32 %v1160_v20  ;;  %v1172_v56 = vand.u32 2147483648, %v1160_v20  ;;  %vm1166_vm5 = vweird.f32 %v1160_v20  ;;  %v1170_v60 = vand.u32 2147483647, %v1160_v20 }
 0x3d4   : > { %v1173_v2 = vor.u32 1.1754944e-38, %v1172_v56  ;;  %vm1171_vm7 = vcmp.eq.f32.partialorder %v1170_v60, 8.507059e+37 }
 0x3d5   : > { %v1952_v27 = vpop.eup %1951 }
 0x3d6   : > { %v1140_v44 = vadd.f32 1.0, %v1952_v27 }
 0x3d8   : > { %1955 = vrcp.f32 %v1140_v44  ;;  %v1954_v48 = vpop.eup %1953  ;;  %v1152_v39 = vand.u32 2147483648, %v1140_v44  ;;  %v1150_v42 = vand.u32 2147483647, %v1140_v44  ;;  %vm1146_vm1 = vweird.f32 %v1140_v44 }
 0x3d9   : > { %v1162_v29 = vmul.f32 %v1954_v48, %v1160_v20  ;;  %vm1167_vm4 = vweird.f32 %v1954_v48 }
 0x3da   : > { %v1153_v47 = vor.u32 1.1754944e-38, %v1152_v39  ;;  %vm1151_vm3 = vcmp.eq.f32.partialorder %v1150_v42, 8.507059e+37  ;;  %vm1168_vm6 = vmor %vm1166_vm5, %vm1167_vm4 }
 0x3db   : > { %v1163_v34 = vsub.f32 1.0, %v1162_v29 }
 0x3dd   : > { %v1164_v41 = vmul.f32 %v1954_v48, %v1163_v34 }
 0x3de   : > { %v1956_v32 = vpop.eup %1955 }
 0x3df   : > { %v1142_v33 = vmul.f32 %v1956_v32, %v1140_v44  ;;  %vm1147_vm0 = vweird.f32 %v1956_v32  ;;  %v1165_v25 = vadd.f32 %v1954_v48, %v1164_v41 }
 0x3e0   : > { %vm1148_vm2 = vmor %vm1146_vm1, %vm1147_vm0 }
 0x3e1   : > { %v1143_v36 = vsub.f32 1.0, %v1142_v33  ;;  %v1169_v24 = vsel %vm1168_vm6, %v1954_v48, %v1165_v25 }
 0x3e2   : > { %v1174_v1 = vsel %vm1171_vm7, %v1173_v2, %v1169_v24 }
 0x3e3   : > { %v1144_v40 = vmul.f32 %v1956_v32, %v1143_v36  ;;  %v1179_v4 = vsub.f32 1.0, %v1174_v1  ;;  %v1181_v13 = vmul.f32 %v1174_v1, %v2440_v3 }
 0x3e5   : > { %v1145_v43 = vadd.f32 %v1956_v32, %v1144_v40 }
 0x3e7   : > { %v1149_v54 = vsel %vm1148_vm2, %v1956_v32, %v1145_v43 }
 0x3e8   : > { %v1154_v51 = vsel %vm1151_vm3, %v1153_v47, %v1149_v54 }
 0x3e9   : > { %v1176_v58 = vmul.f32 %v1154_v51, %v1133_v49 }
 0x3eb   : > { %v1177_v0 = vadd.f32 %v1176_v58, %v2384_v45 }
 0x3ed   : > { %1957 = vtanh.f32 %v1177_v0 }
 0x3f3   : > { %v1958_v5 = vpop.eup %1957 }
 0x3f4   : > { %v1180_v9 = vmul.f32 %v1958_v5, %v1179_v4 }
 0x3f6   : > { %v1182_v35 = vadd.f32 %v1181_v13, %v1180_v9  ;;  %v1284_v13 = vpop.permute.xlu0 %1283 }
 0x3f7   : > { %vm1285_vm2 = vcmp.eq.s32.totalorder %v1284_v13, 1 }
 0x3f8   : > { %v2463_v15 = vsel %vm1188_vm8, %v1182_v35, %v2440_v3 }
 0x3f9   : > { %v1190_v8 = vpack.c.bf16 %v2463_v15, %v2463_v15 }
 0x3fb   : > { %1827 = vmatmul.msk.bf16.vlgmr.msrb.gmra.mxu0 %vm772_vm12, %v1190_v8  ;;  %1828 = vmatmul.msk.bf16.vlgmr.msrb.gmra.mxu2 %vm772_vm12, %v1190_v8 }
 0x3fc   : > { %1829 = vmatmul.msk.bf16.vlgmr.msra.gmra.mxu1 %vm772_vm12, %v1190_v8  ;;  %1420 = vmatpush.bf16.msrb.mxu0 %v2303_v26 }
 0x3fd   : > { %1491 = vmatpush.bf16.msrb.mxu2 %v2265_v53  ;;  %1504 = vmatpush.bf16.msra.mxu1 %v2275_v63 }
 0x400   : > { %1421 = vmatpush.bf16.msrb.mxu0 %v2307_v28 }
 0x401   : > { %1492 = vmatpush.bf16.msrb.mxu2 %v2285_v10  ;;  %1505 = vmatpush.bf16.msra.mxu1 %v2291_v12 }
 0x478   : > { %v1203_v45 = vpop.f32.mrf.mxu0 }
 0x479   : > { %v1204_v3 = vadd.f32 %v2363_v62, %v1203_v45  ;;  %v1229_v16 = vpop.f32.mrf.mxu1 }
 0x47a   : > { %v1230_v41 = vadd.f32 %v2377_v30, %v1229_v16 }
 0x47b   : > { %v1233_v38 = vadd.f32 %v1204_v3, %v2346_v46 }
 0x47d   : > { %v1830_v17 = vmul.f32 -1.442695, %v1233_v38 }
 0x47e   : > { %v1216_v19 = vpop.f32.mrf.mxu2 }
 0x47f   : > { %1959 = vpow2.f32 %v1830_v17  ;;  %v1217_v20 = vadd.f32 %v2369_v11, %v1216_v19 }
 0x480   : > { %v1205_v53 = vpop.f32.mrf.mxu0 }
 0x481   : > { %v1253_v63 = vadd.f32 %v1217_v20, %v2352_v52  ;;  %v1231_v22 = vpop.f32.mrf.mxu1 }
 0x483   : > { %v1831_v23 = vmul.f32 -1.442695, %v1253_v63 }
 0x485   : > { %v1960_v27 = vpop.eup %1959  ;;  %1961 = vpow2.f32 %v1831_v23 }
 0x486   : > { %v1237_v10 = vadd.f32 1.0, %v1960_v27  ;;  %v1218_v12 = vpop.f32.mrf.mxu2 }
 0x488   : > { %1963 = vrcp.f32 %v1237_v10  ;;  %v1249_v33 = vand.u32 2147483648, %v1237_v10  ;;  %v1247_v36 = vand.u32 2147483647, %v1237_v10  ;;  %vm1243_vm10 = vweird.f32 %v1237_v10 }
 0x48a   : > { %v1250_v42 = vor.u32 1.1754944e-38, %v1249_v33  ;;  %vm1248_vm13 = vcmp.eq.f32.partialorder %v1247_v36, 8.507059e+37 }
 0x48b   : > { %v1962_v44 = vpop.eup %1961 }
 0x48c   : > { %v1257_v48 = vadd.f32 1.0, %v1962_v44 }
 0x48e   : > { %v1964_v29 = vpop.eup %1963  ;;  %1965 = vrcp.f32 %v1257_v48  ;;  %v1269_v25 = vand.u32 2147483648, %v1257_v48  ;;  %v1267_v56 = vand.u32 2147483647, %v1257_v48  ;;  %vm1263_vm15 = vweird.f32 %v1257_v48 }
 0x48f   : > { %v1239_v46 = vmul.f32 %v1964_v29, %v1237_v10  ;;  %vm1244_vm9 = vweird.f32 %v1964_v29 }
 0x490   : > { %vm1245_vm11 = vmor %vm1243_vm10, %vm1244_vm9  ;;  %v1270_v24 = vor.u32 1.1754944e-38, %v1269_v25  ;;  %vm1268_vm1 = vcmp.eq.f32.partialorder %v1267_v56, 8.507059e+37 }
 0x491   : > { %v1240_v32 = vsub.f32 1.0, %v1239_v46 }
 0x493   : > { %v1241_v34 = vmul.f32 %v1964_v29, %v1240_v32 }
 0x494   : > { %v1966_v39 = vpop.eup %1965 }
 0x495   : > { %v1242_v40 = vadd.f32 %v1964_v29, %v1241_v34  ;;  %v1259_v52 = vmul.f32 %v1966_v39, %v1257_v48  ;;  %vm1264_vm14 = vweird.f32 %v1966_v39 }
 0x496   : > { %vm1265_vm0 = vmor %vm1263_vm15, %vm1264_vm14 }
 0x497   : > { %v1246_v43 = vsel %vm1245_vm11, %v1964_v29, %v1242_v40  ;;  %v1260_v47 = vsub.f32 1.0, %v1259_v52 }
 0x498   : > { %v1251_v49 = vsel %vm1248_vm13, %v1250_v42, %v1246_v43 }
 0x499   : > { %v1273_v54 = vmul.f32 %v1251_v49, %v1230_v41  ;;  %v1261_v51 = vmul.f32 %v1966_v39, %v1260_v47 }
 0x49b   : > { %v1274_v58 = vadd.f32 %v1273_v54, %v2388_v6  ;;  %v1262_v60 = vadd.f32 %v1966_v39, %v1261_v51 }
 0x49d   : > { %1967 = vtanh.f32 %v1274_v58  ;;  %v1266_v0 = vsel %vm1265_vm0, %v1966_v39, %v1262_v60  ;;  %v1381_v60 = vpop.permute.xlu1 %1380 }
 0x49e   : > { %v1271_v2 = vsel %vm1268_vm1, %v1270_v24, %v1266_v0  ;;  %vm1382_vm11 = vcmp.eq.s32.totalorder %v1381_v60, 1 }
 0x49f   : > { %v1276_v1 = vsub.f32 1.0, %v1271_v2  ;;  %v1278_v9 = vmul.f32 %v1271_v2, %v2463_v15 }
 0x4a3   : > { %v1968_v4 = vpop.eup %1967 }
 0x4a4   : > { %v1277_v5 = vmul.f32 %v1968_v4, %v1276_v1 }
 0x4a6   : > { %v1279_v14 = vadd.f32 %v1278_v9, %v1277_v5 }
 0x4a8   : > { %v2484_v35 = vsel %vm1285_vm2, %v1279_v14, %v2463_v15 }
 0x4a9   : > { %v1287_v6 = vpack.c.bf16 %v2484_v35, %v2484_v35 }
 0x4ab   : > { %1832 = vmatmul.msk.bf16.vlgmr.msra.gmra.mxu3 %vm772_vm12, %v1287_v6  ;;  %1833 = vmatmul.msk.bf16.vlgmr.msra.gmra.mxu0 %vm772_vm12, %v1287_v6 }
 0x4ac   : > { %1834 = vmatmul.msk.bf16.vlgmr.msra.gmra.mxu2 %vm772_vm12, %v1287_v6  ;;  %1517 = vmatpush.bf16.msra.mxu3 %v2303_v26 }
 0x4b0   : > { %1518 = vmatpush.bf16.msra.mxu3 %v2307_v28 }
 0x528   : > { %v1313_v8 = vpop.f32.mrf.mxu0 }
 0x529   : > { %v1314_v45 = vadd.f32 %v2369_v11, %v1313_v8 }
 0x52b   : > { %v1350_v3 = vadd.f32 %v1314_v45, %v2356_v57 }
 0x52d   : > { %v1836_v15 = vmul.f32 -1.442695, %v1350_v3 }
 0x52e   : > { %v1300_v16 = vpop.f32.mrf.mxu3 }
 0x52f   : > { %1969 = vpow2.f32 %v1836_v15  ;;  %v1301_v38 = vadd.f32 %v2363_v62, %v1300_v16  ;;  %v1326_v17 = vpop.f32.mrf.mxu2 }
 0x530   : > { %v1315_v19 = vpop.f32.mrf.mxu0  ;;  %v1327_v39 = vadd.f32 %v2377_v30, %v1326_v17 }
 0x531   : > { %v1330_v20 = vadd.f32 %v1301_v38, %v2350_v50 }
 0x533   : > { %v1835_v53 = vmul.f32 -1.442695, %v1330_v20 }
 0x535   : > { %v1970_v63 = vpop.eup %1969  ;;  %1971 = vpow2.f32 %v1835_v53 }
 0x536   : > { %v1354_v26 = vadd.f32 1.0, %v1970_v63  ;;  %v1302_v22 = vpop.f32.mrf.mxu3 }
 0x537   : > { %v1328_v28 = vpop.f32.mrf.mxu2 }
 0x538   : > { %1973 = vrcp.f32 %v1354_v26  ;;  %v1366_v41 = vand.u32 2147483648, %v1354_v26  ;;  %vm1360_vm8 = vweird.f32 %v1354_v26  ;;  %v1364_v47 = vand.u32 2147483647, %v1354_v26 }
 0x53a   : > { %v1367_v51 = vor.u32 1.1754944e-38, %v1366_v41  ;;  %vm1365_vm10 = vcmp.eq.f32.partialorder %v1364_v47, 8.507059e+37  ;;  %v1478_v41 = vpop.permute.xlu2 %1477 }
 0x53b   : > { %v1972_v23 = vpop.eup %1971 }
 0x53c   : > { %v1334_v27 = vadd.f32 1.0, %v1972_v23 }
 0x53e   : > { %1975 = vrcp.f32 %v1334_v27  ;;  %v1974_v57 = vpop.eup %1973  ;;  %v1346_v46 = vand.u32 2147483648, %v1334_v27  ;;  %v1344_v50 = vand.u32 2147483647, %v1334_v27  ;;  %vm1340_vm4 = vweird.f32 %v1334_v27 }
 0x53f   : > { %v1356_v10 = vmul.f32 %v1974_v57, %v1354_v26  ;;  %vm1361_vm7 = vweird.f32 %v1974_v57 }
 0x540   : > { %v1347_v36 = vor.u32 1.1754944e-38, %v1346_v46  ;;  %vm1345_vm6 = vcmp.eq.f32.partialorder %v1344_v50, 8.507059e+37  ;;  %vm1362_vm9 = vmor %vm1360_vm8, %vm1361_vm7 }
 0x541   : > { %v1357_v48 = vsub.f32 1.0, %v1356_v10 }
 0x543   : > { %v1358_v33 = vmul.f32 %v1974_v57, %v1357_v48 }
 0x544   : > { %v1976_v12 = vpop.eup %1975 }
 0x545   : > { %v1336_v44 = vmul.f32 %v1976_v12, %v1334_v27  ;;  %vm1341_vm3 = vweird.f32 %v1976_v12  ;;  %v1359_v42 = vadd.f32 %v1974_v57, %v1358_v33 }
 0x546   : > { %vm1342_vm5 = vmor %vm1340_vm4, %vm1341_vm3 }
 0x547   : > { %v1337_v29 = vsub.f32 1.0, %v1336_v44  ;;  %v1363_v54 = vsel %vm1362_vm9, %v1974_v57, %v1359_v42 }
 0x548   : > { %v1368_v25 = vsel %vm1365_vm10, %v1367_v51, %v1363_v54 }
 0x549   : > { %v1338_v32 = vmul.f32 %v1976_v12, %v1337_v29  ;;  %v1373_v56 = vsub.f32 1.0, %v1368_v25  ;;  %v1375_v24 = vmul.f32 %v1368_v25, %v2484_v35 }
 0x54b   : > { %v1339_v34 = vadd.f32 %v1976_v12, %v1338_v32 }
 0x54d   : > { %v1343_v40 = vsel %vm1342_vm5, %v1976_v12, %v1339_v34  ;;  %vm1479_vm5 = vcmp.eq.s32.totalorder %v1478_v41, 1 }
 0x54e   : > { %v1348_v52 = vsel %vm1345_vm6, %v1347_v36, %v1343_v40 }
 0x54f   : > { %v1370_v43 = vmul.f32 %v1348_v52, %v1327_v39 }
 0x551   : > { %v1371_v49 = vadd.f32 %v1370_v43, %v2391_v21 }
 0x553   : > { %1977 = vtanh.f32 %v1371_v49 }
 0x559   : > { %v1978_v58 = vpop.eup %1977 }
 0x55a   : > { %v1374_v0 = vmul.f32 %v1978_v58, %v1373_v56 }
 0x55c   : > { %v1376_v2 = vadd.f32 %v1375_v24, %v1374_v0 }
 0x55e   : > { %v2501_v1 = vsel %vm1382_vm11, %v1376_v2, %v2484_v35 }
 0x55f   : > { %v1384_v4 = vpack.c.bf16 %v2501_v1, %v2501_v1 }
 0x561   : > { %1837 = vmatmul.msk.bf16.vlgmr.msrb.gmra.mxu1 %vm772_vm12, %v1384_v4  ;;  %1838 = vmatmul.msk.bf16.vlgmr.msrb.gmra.mxu3 %vm772_vm12, %v1384_v4 }
 0x562   : > { %1839 = vmatmul.msk.bf16.vlgmr.msrb.gmra.mxu0 %vm772_vm12, %v1384_v4 }
 0x5de   : > { %v1397_v21 = vpop.f32.mrf.mxu1 }
 0x5df   : > { %v1398_v5 = vadd.f32 %v2363_v62, %v1397_v21  ;;  %v1423_v9 = vpop.f32.mrf.mxu0 }
 0x5e0   : > { %v1424_v10 = vadd.f32 %v2377_v30, %v1423_v9 }
 0x5e1   : > { %v1427_v13 = vadd.f32 %v1398_v5, %v2354_v55 }
 0x5e3   : > { %v1840_v14 = vmul.f32 -1.442695, %v1427_v13 }
 0x5e4   : > { %v1410_v6 = vpop.f32.mrf.mxu3 }
 0x5e5   : > { %1979 = vpow2.f32 %v1840_v14  ;;  %v1411_v35 = vadd.f32 %v2369_v11, %v1410_v6 }
 0x5e6   : > { %v1399_v8 = vpop.f32.mrf.mxu1 }
 0x5e7   : > { %v1447_v45 = vadd.f32 %v1411_v35, %v2360_v61  ;;  %v1425_v3 = vpop.f32.mrf.mxu0 }
 0x5e9   : > { %v1841_v15 = vmul.f32 -1.442695, %v1447_v45 }
 0x5eb   : > { %v1980_v16 = vpop.eup %1979  ;;  %1981 = vpow2.f32 %v1841_v15 }
 0x5ec   : > { %v1431_v38 = vadd.f32 1.0, %v1980_v16  ;;  %v1412_v17 = vpop.f32.mrf.mxu3 }
 0x5ee   : > { %1983 = vrcp.f32 %v1431_v38  ;;  %v1443_v26 = vand.u32 2147483648, %v1431_v38  ;;  %v1441_v28 = vand.u32 2147483647, %v1431_v38  ;;  %vm1437_vm14 = vweird.f32 %v1431_v38 }
 0x5f0   : > { %v1444_v57 = vor.u32 1.1754944e-38, %v1443_v26  ;;  %vm1442_vm0 = vcmp.eq.f32.partialorder %v1441_v28, 8.507059e+37 }
 0x5f1   : > { %v1982_v19 = vpop.eup %1981 }
 0x5f2   : > { %v1451_v20 = vadd.f32 1.0, %v1982_v19 }
 0x5f4   : > { %v1984_v53 = vpop.eup %1983  ;;  %1985 = vrcp.f32 %v1451_v20  ;;  %v1463_v32 = vand.u32 2147483648, %v1451_v20  ;;  %v1461_v50 = vand.u32 2147483647, %v1451_v20  ;;  %vm1457_vm2 = vweird.f32 %v1451_v20 }
 0x5f5   : > { %v1433_v55 = vmul.f32 %v1984_v53, %v1431_v38  ;;  %vm1438_vm13 = vweird.f32 %v1984_v53 }
 0x5f6   : > { %vm1439_vm15 = vmor %vm1437_vm14, %vm1438_vm13  ;;  %v1464_v39 = vor.u32 1.1754944e-38, %v1463_v32  ;;  %vm1462_vm4 = vcmp.eq.f32.partialorder %v1461_v50, 8.507059e+37 }
 0x5f7   : > { %v1434_v63 = vsub.f32 1.0, %v1433_v55 }
 0x5f9   : > { %v1435_v22 = vmul.f32 %v1984_v53, %v1434_v63  ;;  %v735_v63 = vadd.f32 %v2380_v37, %v2453_v18 }
 0x5fa   : > { %v1986_v23 = vpop.eup %1985 }
 0x5fb   : > { %v1436_v27 = vadd.f32 %v1984_v53, %v1435_v22  ;;  %v1453_v61 = vmul.f32 %v1986_v23, %v1451_v20  ;;  %vm1458_vm1 = vweird.f32 %v1986_v23 }
 0x5fc   : > { %vm1459_vm3 = vmor %vm1457_vm2, %vm1458_vm1 }
 0x5fd   : > { %v1440_v12 = vsel %vm1439_vm15, %v1984_v53, %v1436_v27  ;;  %v1454_v44 = vsub.f32 1.0, %v1453_v61 }
 0x5fe   : > { %v1445_v48 = vsel %vm1442_vm0, %v1444_v57, %v1440_v12  ;;  %v1575_v12 = vpop.permute.xlu0 %1574 }
 0x5ff   : > { %v1467_v29 = vmul.f32 %v1445_v48, %v1424_v10  ;;  %v1455_v46 = vmul.f32 %v1986_v23, %v1454_v44  ;;  %vm1576_vm15 = vcmp.eq.s32.totalorder %v1575_v12, 1 }
 0x601   : > { %v1468_v33 = vadd.f32 %v1467_v29, %v2400_v31  ;;  %v1456_v34 = vadd.f32 %v1986_v23, %v1455_v46 }
 0x603   : > { %1987 = vtanh.f32 %v1468_v33  ;;  %v1460_v36 = vsel %vm1459_vm3, %v1986_v23, %v1456_v34 }
 0x604   : > { %v1465_v40 = vsel %vm1462_vm4, %v1464_v39, %v1460_v36 }
 0x605   : > { %v1470_v52 = vsub.f32 1.0, %v1465_v40  ;;  %v1472_v47 = vmul.f32 %v1465_v40, %v2501_v1 }
 0x609   : > { %v1988_v42 = vpop.eup %1987 }
 0x60a   : > { %v1471_v43 = vmul.f32 %v1988_v42, %v1470_v52 }
 0x60c   : > { %v1473_v49 = vadd.f32 %v1472_v47, %v1471_v43 }
 0x60e   : > { %v2516_v54 = vsel %vm1479_vm5, %v1473_v49, %v2501_v1 }
 0x60f   : > { %v1481_v31 = vpack.c.bf16 %v2516_v54, %v2516_v54 }
 0x611   : > { %1842 = vmatmul.msk.bf16.vlgmr.msrb.gmra.mxu2 %vm772_vm12, %v1481_v31  ;;  %1843 = vmatmul.msk.bf16.vlgmr.msra.gmra.mxu1 %vm772_vm12, %v1481_v31 }
 0x612   : > { %1844 = vmatmul.msk.bf16.vlgmr.msra.gmra.mxu3 %vm772_vm12, %v1481_v31 }
 0x68e   : > { %v1507_v51 = vpop.f32.mrf.mxu1 }
 0x68f   : > { %v1508_v25 = vadd.f32 %v2369_v11, %v1507_v51 }
 0x691   : > { %v1544_v56 = vadd.f32 %v1508_v25, %v2366_v7 }
 0x693   : > { %v1846_v58 = vmul.f32 -1.442695, %v1544_v56 }
 0x694   : > { %v1494_v60 = vpop.f32.mrf.mxu2 }
 0x695   : > { %1989 = vpow2.f32 %v1846_v58  ;;  %v1495_v0 = vadd.f32 %v2363_v62, %v1494_v60  ;;  %v1520_v24 = vpop.f32.mrf.mxu3 }
 0x696   : > { %v1509_v2 = vpop.f32.mrf.mxu1  ;;  %v1521_v19 = vadd.f32 %v2377_v30, %v1520_v24 }
 0x697   : > { %v1524_v1 = vadd.f32 %v1495_v0, %v2358_v59 }
 0x699   : > { %v1845_v4 = vmul.f32 -1.442695, %v1524_v1 }
 0x69b   : > { %v1990_v21 = vpop.eup %1989  ;;  %1991 = vpow2.f32 %v1845_v4 }
 0x69c   : > { %v1548_v5 = vadd.f32 1.0, %v1990_v21  ;;  %v1496_v9 = vpop.f32.mrf.mxu2 }
 0x69d   : > { %v1522_v13 = vpop.f32.mrf.mxu3 }
 0x69e   : > { %1993 = vrcp.f32 %v1548_v5  ;;  %v1560_v26 = vand.u32 2147483648, %v1548_v5  ;;  %vm1554_vm11 = vweird.f32 %v1548_v5  ;;  %v1558_v28 = vand.u32 2147483647, %v1548_v5 }
 0x6a0   : > { %v1561_v61 = vor.u32 1.1754944e-38, %v1560_v26  ;;  %vm1559_vm14 = vcmp.eq.f32.partialorder %v1558_v28, 8.507059e+37 }
 0x6a1   : > { %v1992_v14 = vpop.eup %1991 }
 0x6a2   : > { %v1528_v11 = vadd.f32 1.0, %v1992_v14 }
 0x6a4   : > { %1995 = vrcp.f32 %v1528_v11  ;;  %v1994_v7 = vpop.eup %1993  ;;  %v1540_v3 = vand.u32 2147483648, %v1528_v11  ;;  %v1538_v59 = vand.u32 2147483647, %v1528_v11  ;;  %vm1534_vm7 = vweird.f32 %v1528_v11 }
 0x6a5   : > { %v1550_v6 = vmul.f32 %v1994_v7, %v1548_v5  ;;  %vm1555_vm10 = vweird.f32 %v1994_v7 }
 0x6a6   : > { %v1541_v17 = vor.u32 1.1754944e-38, %v1540_v3  ;;  %vm1539_vm9 = vcmp.eq.f32.partialorder %v1538_v59, 8.507059e+37  ;;  %vm1556_vm13 = vmor %vm1554_vm11, %vm1555_vm10 }
 0x6a7   : > { %v1551_v45 = vsub.f32 1.0, %v1550_v6 }
 0x6a9   : > { %v1552_v16 = vmul.f32 %v1994_v7, %v1551_v45 }
 0x6aa   : > { %v1996_v35 = vpop.eup %1995 }
 0x6ab   : > { %v1530_v8 = vmul.f32 %v1996_v35, %v1528_v11  ;;  %vm1535_vm6 = vweird.f32 %v1996_v35  ;;  %v1553_v55 = vadd.f32 %v1994_v7, %v1552_v16 }
 0x6ac   : > { %vm1536_vm8 = vmor %vm1534_vm7, %vm1535_vm6 }
 0x6ad   : > { %v1531_v62 = vsub.f32 1.0, %v1530_v8  ;;  %v1557_v27 = vsel %vm1556_vm13, %v1994_v7, %v1553_v55 }
 0x6ae   : > { %v1562_v30 = vsel %vm1559_vm14, %v1561_v61, %v1557_v27 }
 0x6af   : > { %v1532_v15 = vmul.f32 %v1996_v35, %v1531_v62  ;;  %v1567_v57 = vsub.f32 1.0, %v1562_v30  ;;  %v1569_v48 = vmul.f32 %v1562_v30, %v2516_v54 }
 0x6b1   : > { %v1533_v38 = vadd.f32 %v1996_v35, %v1532_v15 }
 0x6b3   : > { %v1537_v20 = vsel %vm1536_vm8, %v1996_v35, %v1533_v38 }
 0x6b4   : > { %v1542_v53 = vsel %vm1539_vm9, %v1541_v17, %v1537_v20 }
 0x6b5   : > { %v1564_v22 = vmul.f32 %v1542_v53, %v1521_v19 }
 0x6b7   : > { %v1565_v23 = vadd.f32 %v1564_v22, %v735_v63 }
 0x6b9   : > { %1997 = vtanh.f32 %v1565_v23 }
 0x6bf   : > { %v1998_v10 = vpop.eup %1997 }
 0x6c0   : > { %v1568_v44 = vmul.f32 %v1998_v10, %v1567_v57 }
 0x6c2   : > { %v1570_v37 = vadd.f32 %v1569_v48, %v1568_v44 }
 0x6c4   : > { %v1577_v18 = vsel %vm1576_vm15, %v1570_v37, %v2516_v54 }
 0x6c5   : > { %1578 = vst.msk [vmem:[%s389_s12] sm:$0xff] %vm772_vm12, %v1577_v18 }
 0x6c6 PF: > { %p17_p7 = scmp.ge.s32.totalorder %s2131_s29, 6   ;;  %s2561_s24 = smov %s2055_s25 }
 0x6c7   : > { %s2562_s25 = smov %s2059_s26  ;;  %s2563_s26 = smov %s2141_s9 }
 0x6c8   : > { %s2564_s27 = smov %s2131_s29  ;;  %19 = sbr.rel (!%p17_p7) target bundleno = 3 (0x3), region = 111 }
 0x6cd   :  { %1598 = vsyncpa [#allocation3], 1 }
 0x6ce   :  { %1600 = vsyncpa [#allocation3 + $0x1], 1 }

</bundles_post_ra>
